<compile_context>
chip_gen: v7x
topology: tpu7x:2x2x1
jax: 0.10.0
libtpu: 0.0.40
codegen_flags: <defaults>
</compile_context>

<pallas_src>
import functools

import jax
import jax.numpy as jnp
from jax.experimental import pallas as pl
from jax.experimental.pallas import tpu as pltpu

BITS = 16
BN_EPS = 1e-5
OFF = 8        # zero-margin rows in the activation scratch (sublane aligned)
CMAX = 128     # every channel dimension is padded to 128 lanes


# layer config: (K, pad, relu, pool_input)
#   pool_input=True means: the input of this layer is MaxPool1d(2,2) of the
#   previous layer's output (torch puts the pool inside conv2/conv5/conv7).
_LAYER_CFG = (
    (5, 2, False, False),   # conv1 (2-D 5x5 conv expressed as banded conv1d)
    (3, 1, True,  False),   # conv2
    (3, 1, True,  True),    # conv3  (input = maxpool of conv2 output)
    (3, 1, True,  False),   # conv4
    (3, 1, True,  False),   # conv5
    (3, 1, True,  True),    # conv6  (input = maxpool of conv5 output)
    (3, 1, True,  False),   # conv7
    (3, 0, True,  True),    # conv8  (input = maxpool of conv7 output)
)


# ----------------------------- fused kernel -----------------------------

def _fused_kernel(L, x_ref, w1_ref, wr_ref, s_ref, b_ref, fcw_ref, fcb_ref,
                  out_ref, act0, act1):
    bufs = (act0, act1)
    zeros_m = jnp.zeros((OFF, CMAX), jnp.float32)
    act0[pl.ds(0, OFF), :] = zeros_m          # top zero margins (conv padding)
    act1[pl.ds(0, OFF), :] = zeros_m

    def read_taps(read_fn, K, pad, lin, pooled):
        # Returns the K shifted (Lout, 128) views of the (optionally 2x
        # max-pooled) padded input, plus the output length.
        if pooled:
            lin = lin // 2
        lout = lin + 2 * pad - (K - 1)
        taps = []
        for k in range(K):
            if pooled:
                start = OFF + 2 * (k - pad)
                ev = read_fn(pl.ds(start, lout, stride=2))
                od = read_fn(pl.ds(start + 1, lout, stride=2))
                taps.append(jnp.maximum(ev, od))     # fused MaxPool1d(2,2)
            else:
                taps.append(read_fn(pl.ds(OFF + k - pad, lout)))
        return taps, lout

    lcur = L
    acc = None
    for i, (K, pad, relu, pooled) in enumerate(_LAYER_CFG):
        if i == 0:
            read_fn = lambda idx: x_ref[0, idx, :]         # pre-padded input
            w = w1_ref[...]                                # (5*128, 128) bf16
        else:
            src = bufs[(i - 1) % 2]
            read_fn = lambda idx, _src=src: _src[idx, :]
            w = wr_ref[i - 1]                              # (3*128, 128) bf16

        taps, lout = read_taps(read_fn, K, pad, lcur, pooled)
        cols = jnp.concatenate(taps, axis=1)               # (Lout, K*128) f32
        acc = jnp.dot(cols.astype(jnp.bfloat16), w,
                      preferred_element_type=jnp.float32)  # one MXU matmul
        acc = acc * s_ref[pl.ds(i, 1), :] + b_ref[pl.ds(i, 1), :]  # folded BN
        if relu:
            acc = jnp.maximum(acc, 0.0)
        lcur = lout

        if i + 1 < len(_LAYER_CFG):
            dst = bufs[i % 2]
            dst[pl.ds(OFF, lout), :] = acc                 # aligned store
            dst[pl.ds(OFF + lout, OFF), :] = zeros_m       # trailing zero pad

    # conv8 output: (6, 128) -> max over time -> fused FC -> lane-dense store
    emb = jnp.max(acc, axis=0, keepdims=True)              # (1, 128)
    logits = jnp.dot(emb.astype(jnp.bfloat16), fcw_ref[...],
                     preferred_element_type=jnp.float32) + fcb_ref[...]
    out_ref[0] = logits


def _make_call(L, B):
    lp = L + 2 * OFF
    return pl.pallas_call(
        functools.partial(_fused_kernel, L),
        out_shape=jax.ShapeDtypeStruct((B, 1, CMAX), jnp.float32),
        grid=(B,),
        in_specs=[
            pl.BlockSpec((1, lp, CMAX), lambda b: (b, 0, 0)),     # features
            pl.BlockSpec((5 * CMAX, CMAX), lambda b: (0, 0)),     # conv1 w
            pl.BlockSpec((7, 3 * CMAX, CMAX), lambda b: (0, 0, 0)),  # conv2..8 w
            pl.BlockSpec((8, CMAX), lambda b: (0, 0)),            # BN scales
            pl.BlockSpec((8, CMAX), lambda b: (0, 0)),            # BN biases
            pl.BlockSpec((CMAX, CMAX), lambda b: (0, 0)),         # fc weight
            pl.BlockSpec((1, CMAX), lambda b: (0, 0)),            # fc bias
        ],
        out_specs=pl.BlockSpec((1, 1, CMAX), lambda b: (b, 0, 0)),
        scratch_shapes=[
            pltpu.VMEM((2 * OFF + L, CMAX), jnp.float32),   # activation ping
            pltpu.VMEM((2 * OFF + L, CMAX), jnp.float32),   # activation pong
        ],
        compiler_params=pltpu.CompilerParams(
            dimension_semantics=("parallel",)),
    )


# ----------------------------- parameters -----------------------------

def init_params(key, num_class):
    assert num_class <= CMAX
    keys = jax.random.split(key, 64)
    it = iter(keys)

    def nrm(shape, scale=0.1):
        return (scale * jax.random.normal(next(it), shape)).astype(jnp.float32)

    params = {}

    # conv1: Conv2d(1,1,5,5,pad=2) + BatchNorm2d(1)   (no ReLU)
    w5 = nrm((5, 5))
    b1 = nrm(())
    g1 = 1.0 + nrm(())
    be1 = nrm(())
    m1 = nrm(())
    v1 = 1.0 + 0.1 * jax.random.uniform(next(it), ())
    s1 = g1 / jnp.sqrt(v1 + BN_EPS)
    bias1 = be1 + s1 * (b1 - m1)

    # Express the single-channel 5x5 conv as a K=5 conv1d over the 32
    # frequency bins: w1d[kt, h_in, h_out] = w5[h_in - h_out + 2, kt] (banded).
    hh = jnp.arange(32)
    dh = hh[:, None] - hh[None, :] + 2                 # (h_in, h_out)
    band = (dh >= 0) & (dh <= 4)
    w_g = w5[jnp.clip(dh, 0, 4), :]                    # (32, 32, 5)
    w1d = jnp.where(band[:, :, None], w_g, 0.0)        # (32, 32, 5)
    w1d = jnp.transpose(w1d, (2, 0, 1))                # (5, 32, 32)
    w1_full = jnp.zeros((5, CMAX, CMAX), jnp.float32).at[:, :32, :32].set(w1d)
    params['w1'] = w1_full.reshape(5 * CMAX, CMAX).astype(jnp.bfloat16)

    scales = [jnp.zeros((CMAX,), jnp.float32).at[:32].set(s1)]
    biases = [jnp.zeros((CMAX,), jnp.float32).at[:32].set(bias1)]

    # conv2..conv8: Conv1d + BN1d, eval-mode BN folded into scale/bias
    cfg = [(32, 64), (64, 128), (128, 128), (128, 128),
           (128, 128), (128, 64), (64, 32)]
    wr = []
    for cin, cout in cfg:
        w = nrm((3, cin, cout), scale=0.05)            # layout (K, Cin, Cout)
        b = nrm((cout,))
        g = 1.0 + nrm((cout,))
        be = nrm((cout,))
        m = nrm((cout,))
        v = 1.0 + 0.1 * jax.random.uniform(next(it), (cout,))
        s = g / jnp.sqrt(v + BN_EPS)
        wf = jnp.zeros((3, CMAX, CMAX), jnp.float32).at[:, :cin, :cout].set(w)
        wr.append(wf.reshape(3 * CMAX, CMAX))
        scales.append(jnp.zeros((CMAX,), jnp.float32).at[:cout].set(s))
        biases.append(jnp.zeros((CMAX,), jnp.float32)
                      .at[:cout].set(be + s * (b - m)))

    params['wr'] = jnp.stack(wr).astype(jnp.bfloat16)      # (7, 384, 128)
    params['scales'] = jnp.stack(scales)                    # (8, 128) f32
    params['biases'] = jnp.stack(biases)                    # (8, 128) f32

    fcw = nrm((32, num_class))
    fcb = nrm((num_class,))
    params['fc_w'] = (jnp.zeros((CMAX, CMAX), jnp.float32)
                      .at[:32, :num_class].set(fcw).astype(jnp.bfloat16))
    params['fc_b'] = jnp.zeros((1, CMAX), jnp.float32).at[0, :num_class].set(fcb)
    return params


# ----------------------------- forward pass -----------------------------

def audionet_forward(params, x, *, num_class):
    """x: [B, 1, T] waveform -> logits [B, num_class]."""
    B, _, T = x.shape
    upper, lower = 1.0, -1.0
    # Like the PyTorch reference, the range check / rescale is global over the
    # whole batch tensor and compares against 2*upper / 2*lower.
    in_range = jnp.logical_and(jnp.max(x) <= 2 * upper, jnp.min(x) >= 2 * lower)
    x = jnp.where(in_range, x, x / 2 ** (BITS - 1))

    # TODO(synk): the external Preprocessor (spectral front-end) is not part of
    # this module; approximated by deterministic framing into 32-dim frames.
    wav = x[:, 0, :]
    L = T // 32
    assert L >= 8 and L % 8 == 0, "fused kernel assumes frame count % 8 == 0"
    feats = wav[:, : L * 32].reshape(B, L, 32)        # [B, L(time), 32(feat)]
    # one tiny host-side pad: time margin + lane padding to 128 channels
    feats = jnp.pad(feats, ((0, 0), (OFF, OFF), (0, CMAX - 32)))

    len_before_c8 = ((L // 2) // 2) // 2
    if len_before_c8 < 3:
        # TODO(synk): the x.repeat(...)-to-target_len path (inputs < 768
        # samples) is not implemented in the fused kernel.
        raise NotImplementedError("input too short for fused AudioNet kernel")

    out = _make_call(L, B)(
        feats, params['w1'], params['wr'], params['scales'],
        params['biases'], params['fc_w'], params['fc_b'])
    return out[:, 0, :num_class]


# ----------------------------- main -----------------------------

if __name__ == "__main__":
    key = jax.random.PRNGKey(0)
    pkey, xkey = jax.random.split(key)

    num_class = 10
    B, T = 2, 2048     # T = 32 * 64 -> feature length L = 64

    params = init_params(pkey, num_class)
    x = jax.random.uniform(xkey, (B, 1, T), minval=-1.0, maxval=1.0,
                           dtype=jnp.float32)

    fwd = jax.jit(functools.partial(audionet_forward, num_class=num_class))
    logits = fwd(params, x)
    jax.block_until_ready(logits)
    assert logits.shape == (B, num_class)
    assert bool(jnp.all(jnp.isfinite(logits)))
    print("KERNEL_OK")
</pallas_src>

<mosaic_0001>
module attributes {stable_mosaic.version = 11 : i64} {
  func.func @_fused_kernel(%arg0: i32, %arg1: memref<1x80x128xf32, #tpu.memory_space<vmem>>, %arg2: memref<640x128xbf16, #tpu.memory_space<vmem>>, %arg3: memref<7x384x128xbf16, #tpu.memory_space<vmem>>, %arg4: memref<8x128xf32, #tpu.memory_space<vmem>>, %arg5: memref<8x128xf32, #tpu.memory_space<vmem>>, %arg6: memref<128x128xbf16, #tpu.memory_space<vmem>>, %arg7: memref<1x128xf32, #tpu.memory_space<vmem>>, %arg8: memref<1x1x128xf32, #tpu.memory_space<vmem>>, %arg9: memref<80x128xf32, #tpu.memory_space<vmem>>, %arg10: memref<80x128xf32, #tpu.memory_space<vmem>>) attributes {dimension_semantics = [#tpu.dimension_semantics<parallel>], iteration_bounds = array<i64: 2>, scalar_prefetch = 0 : i64, scratch_operands = 2 : i64, tpu.core_type = #tpu.core_type<tc>, window_params = [{transform_indices = @transform_0, window_bounds = array<i64: 1, 80, 128>}, {pipeline_mode = #tpu.pipeline_mode<synchronous>, transform_indices = @transform_1, window_bounds = array<i64: 640, 128>}, {pipeline_mode = #tpu.pipeline_mode<synchronous>, transform_indices = @transform_2, window_bounds = array<i64: 7, 384, 128>}, {pipeline_mode = #tpu.pipeline_mode<synchronous>, transform_indices = @transform_3, window_bounds = array<i64: 8, 128>}, {pipeline_mode = #tpu.pipeline_mode<synchronous>, transform_indices = @transform_4, window_bounds = array<i64: 8, 128>}, {pipeline_mode = #tpu.pipeline_mode<synchronous>, transform_indices = @transform_5, window_bounds = array<i64: 128, 128>}, {pipeline_mode = #tpu.pipeline_mode<synchronous>, transform_indices = @transform_6, window_bounds = array<i64: 1, 128>}, {transform_indices = @transform_7, window_bounds = array<i64: 1, 1, 128>}]} {
    %cst = arith.constant 0.000000e+00 : f32
    %0 = vector.broadcast %cst : f32 to vector<8x128xf32>
    %c0 = arith.constant 0 : index
    %c0_0 = arith.constant 0 : index
    %1 = vector.load %arg9[%c0, %c0_0] : memref<80x128xf32, #tpu.memory_space<vmem>>, vector<8x128xf32>
    tpu.vector_store %arg9[%c0, %c0_0], %0 {strides = array<i32>} : memref<80x128xf32, #tpu.memory_space<vmem>>, vector<8x128xf32>,
    %c0_1 = arith.constant 0 : index
    %c0_2 = arith.constant 0 : index
    %2 = vector.load %arg10[%c0_1, %c0_2] : memref<80x128xf32, #tpu.memory_space<vmem>>, vector<8x128xf32>
    tpu.vector_store %arg10[%c0_1, %c0_2], %0 {strides = array<i32>} : memref<80x128xf32, #tpu.memory_space<vmem>>, vector<8x128xf32>,
    %c0_3 = arith.constant 0 : index
    %c0_4 = arith.constant 0 : index
    %3 = vector.load %arg2[%c0_3, %c0_4] : memref<640x128xbf16, #tpu.memory_space<vmem>>, vector<640x128xbf16>
    %c0_5 = arith.constant 0 : index
    %c6 = arith.constant 6 : index
    %c0_6 = arith.constant 0 : index
    %4 = vector.load %arg1[%c0_5, %c6, %c0_6] : memref<1x80x128xf32, #tpu.memory_space<vmem>>, vector<1x64x128xf32>
    %5 = vector.shape_cast %4 : vector<1x64x128xf32> to vector<64x128xf32>
    %c0_7 = arith.constant 0 : index
    %c7 = arith.constant 7 : index
    %c0_8 = arith.constant 0 : index
    %6 = vector.load %arg1[%c0_7, %c7, %c0_8] : memref<1x80x128xf32, #tpu.memory_space<vmem>>, vector<1x64x128xf32>
    %7 = vector.shape_cast %6 : vector<1x64x128xf32> to vector<64x128xf32>
    %c0_9 = arith.constant 0 : index
    %c8 = arith.constant 8 : index
    %c0_10 = arith.constant 0 : index
    %8 = vector.load %arg1[%c0_9, %c8, %c0_10] : memref<1x80x128xf32, #tpu.memory_space<vmem>>, vector<1x64x128xf32>
    %9 = vector.shape_cast %8 : vector<1x64x128xf32> to vector<64x128xf32>
    %c0_11 = arith.constant 0 : index
    %c9 = arith.constant 9 : index
    %c0_12 = arith.constant 0 : index
    %10 = vector.load %arg1[%c0_11, %c9, %c0_12] : memref<1x80x128xf32, #tpu.memory_space<vmem>>, vector<1x64x128xf32>
    %11 = vector.shape_cast %10 : vector<1x64x128xf32> to vector<64x128xf32>
    %c0_13 = arith.constant 0 : index
    %c10 = arith.constant 10 : index
    %c0_14 = arith.constant 0 : index
    %12 = vector.load %arg1[%c0_13, %c10, %c0_14] : memref<1x80x128xf32, #tpu.memory_space<vmem>>, vector<1x64x128xf32>
    %13 = vector.shape_cast %12 : vector<1x64x128xf32> to vector<64x128xf32>
    %14 = tpu.concatenate %5, %7, %9, %11, %13 in 1 : vector<64x128xf32>, vector<64x128xf32>, vector<64x128xf32>, vector<64x128xf32>, vector<64x128xf32> -> vector<64x640xf32>
    %15 = arith.truncf %14 : vector<64x640xf32> to vector<64x640xbf16>
    %cst_15 = arith.constant dense<0.000000e+00> : vector<64x128xf32>
    %16 = tpu.matmul %15, %3, %cst_15 {dimension_numbers = #tpu.dot_dimension_numbers<[1], [0], [0], [1], [0, 0, 1, 1], [], []>} : vector<64x640xbf16>, vector<640x128xbf16>, vector<64x128xf32> -> vector<64x128xf32>
    %c0_16 = arith.constant 0 : index
    %c0_17 = arith.constant 0 : index
    %17 = vector.load %arg4[%c0_16, %c0_17] : memref<8x128xf32, #tpu.memory_space<vmem>>, vector<1x128xf32>
    %18 = vector.broadcast %17 : vector<1x128xf32> to vector<64x128xf32>
    %19 = arith.mulf %16, %18 : vector<64x128xf32>
    %c0_18 = arith.constant 0 : index
    %c0_19 = arith.constant 0 : index
    %20 = vector.load %arg5[%c0_18, %c0_19] : memref<8x128xf32, #tpu.memory_space<vmem>>, vector<1x128xf32>
    %21 = vector.broadcast %20 : vector<1x128xf32> to vector<64x128xf32>
    %22 = arith.addf %19, %21 : vector<64x128xf32>
    %c8_20 = arith.constant 8 : index
    %c0_21 = arith.constant 0 : index
    %23 = vector.load %arg9[%c8_20, %c0_21] : memref<80x128xf32, #tpu.memory_space<vmem>>, vector<64x128xf32>
    tpu.vector_store %arg9[%c8_20, %c0_21], %22 {strides = array<i32>} : memref<80x128xf32, #tpu.memory_space<vmem>>, vector<64x128xf32>,
    %c72 = arith.constant 72 : index
    %c0_22 = arith.constant 0 : index
    %24 = vector.load %arg9[%c72, %c0_22] : memref<80x128xf32, #tpu.memory_space<vmem>>, vector<8x128xf32>
    tpu.vector_store %arg9[%c72, %c0_22], %0 {strides = array<i32>} : memref<80x128xf32, #tpu.memory_space<vmem>>, vector<8x128xf32>,
    %c0_23 = arith.constant 0 : index
    %c0_24 = arith.constant 0 : index
    %c0_25 = arith.constant 0 : index
    %25 = vector.load %arg3[%c0_23, %c0_24, %c0_25] : memref<7x384x128xbf16, #tpu.memory_space<vmem>>, vector<1x384x128xbf16>
    %26 = vector.shape_cast %25 : vector<1x384x128xbf16> to vector<384x128xbf16>
    %c7_26 = arith.constant 7 : index
    %c0_27 = arith.constant 0 : index
    %27 = vector.load %arg9[%c7_26, %c0_27] : memref<80x128xf32, #tpu.memory_space<vmem>>, vector<64x128xf32>
    %c8_28 = arith.constant 8 : index
    %c0_29 = arith.constant 0 : index
    %28 = vector.load %arg9[%c8_28, %c0_29] : memref<80x128xf32, #tpu.memory_space<vmem>>, vector<64x128xf32>
    %c9_30 = arith.constant 9 : index
    %c0_31 = arith.constant 0 : index
    %29 = vector.load %arg9[%c9_30, %c0_31] : memref<80x128xf32, #tpu.memory_space<vmem>>, vector<64x128xf32>
    %30 = tpu.concatenate %27, %28, %29 in 1 : vector<64x128xf32>, vector<64x128xf32>, vector<64x128xf32> -> vector<64x384xf32>
    %31 = arith.truncf %30 : vector<64x384xf32> to vector<64x384xbf16>
    %cst_32 = arith.constant dense<0.000000e+00> : vector<64x128xf32>
    %32 = tpu.matmul %31, %26, %cst_32 {dimension_numbers = #tpu.dot_dimension_numbers<[1], [0], [0], [1], [0, 0, 1, 1], [], []>} : vector<64x384xbf16>, vector<384x128xbf16>, vector<64x128xf32> -> vector<64x128xf32>
    %c1 = arith.constant 1 : index
    %c0_33 = arith.constant 0 : index
    %33 = vector.load %arg4[%c1, %c0_33] : memref<8x128xf32, #tpu.memory_space<vmem>>, vector<1x128xf32>
    %34 = vector.broadcast %33 : vector<1x128xf32> to vector<64x128xf32>
    %35 = arith.mulf %32, %34 : vector<64x128xf32>
    %c1_34 = arith.constant 1 : index
    %c0_35 = arith.constant 0 : index
    %36 = vector.load %arg5[%c1_34, %c0_35] : memref<8x128xf32, #tpu.memory_space<vmem>>, vector<1x128xf32>
    %37 = vector.broadcast %36 : vector<1x128xf32> to vector<64x128xf32>
    %38 = arith.addf %35, %37 : vector<64x128xf32>
    %cst_36 = arith.constant 0.000000e+00 : f32
    %39 = vector.broadcast %cst_36 : f32 to vector<64x128xf32>
    %40 = arith.maximumf %38, %39 : vector<64x128xf32>
    %c8_37 = arith.constant 8 : index
    %c0_38 = arith.constant 0 : index
    %41 = vector.load %arg10[%c8_37, %c0_38] : memref<80x128xf32, #tpu.memory_space<vmem>>, vector<64x128xf32>
    tpu.vector_store %arg10[%c8_37, %c0_38], %40 {strides = array<i32>} : memref<80x128xf32, #tpu.memory_space<vmem>>, vector<64x128xf32>,
    %c72_39 = arith.constant 72 : index
    %c0_40 = arith.constant 0 : index
    %42 = vector.load %arg10[%c72_39, %c0_40] : memref<80x128xf32, #tpu.memory_space<vmem>>, vector<8x128xf32>
    tpu.vector_store %arg10[%c72_39, %c0_40], %0 {strides = array<i32>} : memref<80x128xf32, #tpu.memory_space<vmem>>, vector<8x128xf32>,
    %c1_41 = arith.constant 1 : index
    %c0_42 = arith.constant 0 : index
    %c0_43 = arith.constant 0 : index
    %43 = vector.load %arg3[%c1_41, %c0_42, %c0_43] : memref<7x384x128xbf16, #tpu.memory_space<vmem>>, vector<1x384x128xbf16>
    %44 = vector.shape_cast %43 : vector<1x384x128xbf16> to vector<384x128xbf16>
    %c6_44 = arith.constant 6 : index
    %c0_45 = arith.constant 0 : index
    %45 = tpu.strided_load %arg10[%c6_44, %c0_45] {strides = array<i32: 2, 1>} : memref<80x128xf32, #tpu.memory_space<vmem>>, vector<32x128xf32>
    %c7_46 = arith.constant 7 : index
    %c0_47 = arith.constant 0 : index
    %46 = tpu.strided_load %arg10[%c7_46, %c0_47] {strides = array<i32: 2, 1>} : memref<80x128xf32, #tpu.memory_space<vmem>>, vector<32x128xf32>
    %47 = arith.maximumf %45, %46 : vector<32x128xf32>
    %c8_48 = arith.constant 8 : index
    %c0_49 = arith.constant 0 : index
    %48 = tpu.strided_load %arg10[%c8_48, %c0_49] {strides = array<i32: 2, 1>} : memref<80x128xf32, #tpu.memory_space<vmem>>, vector<32x128xf32>
    %c9_50 = arith.constant 9 : index
    %c0_51 = arith.constant 0 : index
    %49 = tpu.strided_load %arg10[%c9_50, %c0_51] {strides = array<i32: 2, 1>} : memref<80x128xf32, #tpu.memory_space<vmem>>, vector<32x128xf32>
    %50 = arith.maximumf %48, %49 : vector<32x128xf32>
    %c10_52 = arith.constant 10 : index
    %c0_53 = arith.constant 0 : index
    %51 = tpu.strided_load %arg10[%c10_52, %c0_53] {strides = array<i32: 2, 1>} : memref<80x128xf32, #tpu.memory_space<vmem>>, vector<32x128xf32>
    %c11 = arith.constant 11 : index
    %c0_54 = arith.constant 0 : index
    %52 = tpu.strided_load %arg10[%c11, %c0_54] {strides = array<i32: 2, 1>} : memref<80x128xf32, #tpu.memory_space<vmem>>, vector<32x128xf32>
    %53 = arith.maximumf %51, %52 : vector<32x128xf32>
    %54 = tpu.concatenate %47, %50, %53 in 1 : vector<32x128xf32>, vector<32x128xf32>, vector<32x128xf32> -> vector<32x384xf32>
    %55 = arith.truncf %54 : vector<32x384xf32> to vector<32x384xbf16>
    %cst_55 = arith.constant dense<0.000000e+00> : vector<32x128xf32>
    %56 = tpu.matmul %55, %44, %cst_55 {dimension_numbers = #tpu.dot_dimension_numbers<[1], [0], [0], [1], [0, 0, 1, 1], [], []>} : vector<32x384xbf16>, vector<384x128xbf16>, vector<32x128xf32> -> vector<32x128xf32>
    %c2 = arith.constant 2 : index
    %c0_56 = arith.constant 0 : index
    %57 = vector.load %arg4[%c2, %c0_56] : memref<8x128xf32, #tpu.memory_space<vmem>>, vector<1x128xf32>
    %58 = vector.broadcast %57 : vector<1x128xf32> to vector<32x128xf32>
    %59 = arith.mulf %56, %58 : vector<32x128xf32>
    %c2_57 = arith.constant 2 : index
    %c0_58 = arith.constant 0 : index
    %60 = vector.load %arg5[%c2_57, %c0_58] : memref<8x128xf32, #tpu.memory_space<vmem>>, vector<1x128xf32>
    %61 = vector.broadcast %60 : vector<1x128xf32> to vector<32x128xf32>
    %62 = arith.addf %59, %61 : vector<32x128xf32>
    %cst_59 = arith.constant 0.000000e+00 : f32
    %63 = vector.broadcast %cst_59 : f32 to vector<32x128xf32>
    %64 = arith.maximumf %62, %63 : vector<32x128xf32>
    %c8_60 = arith.constant 8 : index
    %c0_61 = arith.constant 0 : index
    %65 = vector.load %arg9[%c8_60, %c0_61] : memref<80x128xf32, #tpu.memory_space<vmem>>, vector<32x128xf32>
    tpu.vector_store %arg9[%c8_60, %c0_61], %64 {strides = array<i32>} : memref<80x128xf32, #tpu.memory_space<vmem>>, vector<32x128xf32>,
    %c40 = arith.constant 40 : index
    %c0_62 = arith.constant 0 : index
    %66 = vector.load %arg9[%c40, %c0_62] : memref<80x128xf32, #tpu.memory_space<vmem>>, vector<8x128xf32>
    tpu.vector_store %arg9[%c40, %c0_62], %0 {strides = array<i32>} : memref<80x128xf32, #tpu.memory_space<vmem>>, vector<8x128xf32>,
    %c2_63 = arith.constant 2 : index
    %c0_64 = arith.constant 0 : index
    %c0_65 = arith.constant 0 : index
    %67 = vector.load %arg3[%c2_63, %c0_64, %c0_65] : memref<7x384x128xbf16, #tpu.memory_space<vmem>>, vector<1x384x128xbf16>
    %68 = vector.shape_cast %67 : vector<1x384x128xbf16> to vector<384x128xbf16>
    %c7_66 = arith.constant 7 : index
    %c0_67 = arith.constant 0 : index
    %69 = vector.load %arg9[%c7_66, %c0_67] : memref<80x128xf32, #tpu.memory_space<vmem>>, vector<32x128xf32>
    %c8_68 = arith.constant 8 : index
    %c0_69 = arith.constant 0 : index
    %70 = vector.load %arg9[%c8_68, %c0_69] : memref<80x128xf32, #tpu.memory_space<vmem>>, vector<32x128xf32>
    %c9_70 = arith.constant 9 : index
    %c0_71 = arith.constant 0 : index
    %71 = vector.load %arg9[%c9_70, %c0_71] : memref<80x128xf32, #tpu.memory_space<vmem>>, vector<32x128xf32>
    %72 = tpu.concatenate %69, %70, %71 in 1 : vector<32x128xf32>, vector<32x128xf32>, vector<32x128xf32> -> vector<32x384xf32>
    %73 = arith.truncf %72 : vector<32x384xf32> to vector<32x384xbf16>
    %cst_72 = arith.constant dense<0.000000e+00> : vector<32x128xf32>
    %74 = tpu.matmul %73, %68, %cst_72 {dimension_numbers = #tpu.dot_dimension_numbers<[1], [0], [0], [1], [0, 0, 1, 1], [], []>} : vector<32x384xbf16>, vector<384x128xbf16>, vector<32x128xf32> -> vector<32x128xf32>
    %c3 = arith.constant 3 : index
    %c0_73 = arith.constant 0 : index
    %75 = vector.load %arg4[%c3, %c0_73] : memref<8x128xf32, #tpu.memory_space<vmem>>, vector<1x128xf32>
    %76 = vector.broadcast %75 : vector<1x128xf32> to vector<32x128xf32>
    %77 = arith.mulf %74, %76 : vector<32x128xf32>
    %c3_74 = arith.constant 3 : index
    %c0_75 = arith.constant 0 : index
    %78 = vector.load %arg5[%c3_74, %c0_75] : memref<8x128xf32, #tpu.memory_space<vmem>>, vector<1x128xf32>
    %79 = vector.broadcast %78 : vector<1x128xf32> to vector<32x128xf32>
    %80 = arith.addf %77, %79 : vector<32x128xf32>
    %cst_76 = arith.constant 0.000000e+00 : f32
    %81 = vector.broadcast %cst_76 : f32 to vector<32x128xf32>
    %82 = arith.maximumf %80, %81 : vector<32x128xf32>
    %c8_77 = arith.constant 8 : index
    %c0_78 = arith.constant 0 : index
    %83 = vector.load %arg10[%c8_77, %c0_78] : memref<80x128xf32, #tpu.memory_space<vmem>>, vector<32x128xf32>
    tpu.vector_store %arg10[%c8_77, %c0_78], %82 {strides = array<i32>} : memref<80x128xf32, #tpu.memory_space<vmem>>, vector<32x128xf32>,
    %c40_79 = arith.constant 40 : index
    %c0_80 = arith.constant 0 : index
    %84 = vector.load %arg10[%c40_79, %c0_80] : memref<80x128xf32, #tpu.memory_space<vmem>>, vector<8x128xf32>
    tpu.vector_store %arg10[%c40_79, %c0_80], %0 {strides = array<i32>} : memref<80x128xf32, #tpu.memory_space<vmem>>, vector<8x128xf32>,
    %c3_81 = arith.constant 3 : index
    %c0_82 = arith.constant 0 : index
    %c0_83 = arith.constant 0 : index
    %85 = vector.load %arg3[%c3_81, %c0_82, %c0_83] : memref<7x384x128xbf16, #tpu.memory_space<vmem>>, vector<1x384x128xbf16>
    %86 = vector.shape_cast %85 : vector<1x384x128xbf16> to vector<384x128xbf16>
    %c7_84 = arith.constant 7 : index
    %c0_85 = arith.constant 0 : index
    %87 = vector.load %arg10[%c7_84, %c0_85] : memref<80x128xf32, #tpu.memory_space<vmem>>, vector<32x128xf32>
    %c8_86 = arith.constant 8 : index
    %c0_87 = arith.constant 0 : index
    %88 = vector.load %arg10[%c8_86, %c0_87] : memref<80x128xf32, #tpu.memory_space<vmem>>, vector<32x128xf32>
    %c9_88 = arith.constant 9 : index
    %c0_89 = arith.constant 0 : index
    %89 = vector.load %arg10[%c9_88, %c0_89] : memref<80x128xf32, #tpu.memory_space<vmem>>, vector<32x128xf32>
    %90 = tpu.concatenate %87, %88, %89 in 1 : vector<32x128xf32>, vector<32x128xf32>, vector<32x128xf32> -> vector<32x384xf32>
    %91 = arith.truncf %90 : vector<32x384xf32> to vector<32x384xbf16>
    %cst_90 = arith.constant dense<0.000000e+00> : vector<32x128xf32>
    %92 = tpu.matmul %91, %86, %cst_90 {dimension_numbers = #tpu.dot_dimension_numbers<[1], [0], [0], [1], [0, 0, 1, 1], [], []>} : vector<32x384xbf16>, vector<384x128xbf16>, vector<32x128xf32> -> vector<32x128xf32>
    %c4 = arith.constant 4 : index
    %c0_91 = arith.constant 0 : index
    %93 = vector.load %arg4[%c4, %c0_91] : memref<8x128xf32, #tpu.memory_space<vmem>>, vector<1x128xf32>
    %94 = vector.broadcast %93 : vector<1x128xf32> to vector<32x128xf32>
    %95 = arith.mulf %92, %94 : vector<32x128xf32>
    %c4_92 = arith.constant 4 : index
    %c0_93 = arith.constant 0 : index
    %96 = vector.load %arg5[%c4_92, %c0_93] : memref<8x128xf32, #tpu.memory_space<vmem>>, vector<1x128xf32>
    %97 = vector.broadcast %96 : vector<1x128xf32> to vector<32x128xf32>
    %98 = arith.addf %95, %97 : vector<32x128xf32>
    %cst_94 = arith.constant 0.000000e+00 : f32
    %99 = vector.broadcast %cst_94 : f32 to vector<32x128xf32>
    %100 = arith.maximumf %98, %99 : vector<32x128xf32>
    %c8_95 = arith.constant 8 : index
    %c0_96 = arith.constant 0 : index
    %101 = vector.load %arg9[%c8_95, %c0_96] : memref<80x128xf32, #tpu.memory_space<vmem>>, vector<32x128xf32>
    tpu.vector_store %arg9[%c8_95, %c0_96], %100 {strides = array<i32>} : memref<80x128xf32, #tpu.memory_space<vmem>>, vector<32x128xf32>,
    %c40_97 = arith.constant 40 : index
    %c0_98 = arith.constant 0 : index
    %102 = vector.load %arg9[%c40_97, %c0_98] : memref<80x128xf32, #tpu.memory_space<vmem>>, vector<8x128xf32>
    tpu.vector_store %arg9[%c40_97, %c0_98], %0 {strides = array<i32>} : memref<80x128xf32, #tpu.memory_space<vmem>>, vector<8x128xf32>,
    %c4_99 = arith.constant 4 : index
    %c0_100 = arith.constant 0 : index
    %c0_101 = arith.constant 0 : index
    %103 = vector.load %arg3[%c4_99, %c0_100, %c0_101] : memref<7x384x128xbf16, #tpu.memory_space<vmem>>, vector<1x384x128xbf16>
    %104 = vector.shape_cast %103 : vector<1x384x128xbf16> to vector<384x128xbf16>
    %c6_102 = arith.constant 6 : index
    %c0_103 = arith.constant 0 : index
    %105 = tpu.strided_load %arg9[%c6_102, %c0_103] {strides = array<i32: 2, 1>} : memref<80x128xf32, #tpu.memory_space<vmem>>, vector<16x128xf32>
    %c7_104 = arith.constant 7 : index
    %c0_105 = arith.constant 0 : index
    %106 = tpu.strided_load %arg9[%c7_104, %c0_105] {strides = array<i32: 2, 1>} : memref<80x128xf32, #tpu.memory_space<vmem>>, vector<16x128xf32>
    %107 = arith.maximumf %105, %106 : vector<16x128xf32>
    %c8_106 = arith.constant 8 : index
    %c0_107 = arith.constant 0 : index
    %108 = tpu.strided_load %arg9[%c8_106, %c0_107] {strides = array<i32: 2, 1>} : memref<80x128xf32, #tpu.memory_space<vmem>>, vector<16x128xf32>
    %c9_108 = arith.constant 9 : index
    %c0_109 = arith.constant 0 : index
    %109 = tpu.strided_load %arg9[%c9_108, %c0_109] {strides = array<i32: 2, 1>} : memref<80x128xf32, #tpu.memory_space<vmem>>, vector<16x128xf32>
    %110 = arith.maximumf %108, %109 : vector<16x128xf32>
    %c10_110 = arith.constant 10 : index
    %c0_111 = arith.constant 0 : index
    %111 = tpu.strided_load %arg9[%c10_110, %c0_111] {strides = array<i32: 2, 1>} : memref<80x128xf32, #tpu.memory_space<vmem>>, vector<16x128xf32>
    %c11_112 = arith.constant 11 : index
    %c0_113 = arith.constant 0 : index
    %112 = tpu.strided_load %arg9[%c11_112, %c0_113] {strides = array<i32: 2, 1>} : memref<80x128xf32, #tpu.memory_space<vmem>>, vector<16x128xf32>
    %113 = arith.maximumf %111, %112 : vector<16x128xf32>
    %114 = tpu.concatenate %107, %110, %113 in 1 : vector<16x128xf32>, vector<16x128xf32>, vector<16x128xf32> -> vector<16x384xf32>
    %115 = arith.truncf %114 : vector<16x384xf32> to vector<16x384xbf16>
    %cst_114 = arith.constant dense<0.000000e+00> : vector<16x128xf32>
    %116 = tpu.matmul %115, %104, %cst_114 {dimension_numbers = #tpu.dot_dimension_numbers<[1], [0], [0], [1], [0, 0, 1, 1], [], []>} : vector<16x384xbf16>, vector<384x128xbf16>, vector<16x128xf32> -> vector<16x128xf32>
    %c5 = arith.constant 5 : index
    %c0_115 = arith.constant 0 : index
    %117 = vector.load %arg4[%c5, %c0_115] : memref<8x128xf32, #tpu.memory_space<vmem>>, vector<1x128xf32>
    %118 = vector.broadcast %117 : vector<1x128xf32> to vector<16x128xf32>
    %119 = arith.mulf %116, %118 : vector<16x128xf32>
    %c5_116 = arith.constant 5 : index
    %c0_117 = arith.constant 0 : index
    %120 = vector.load %arg5[%c5_116, %c0_117] : memref<8x128xf32, #tpu.memory_space<vmem>>, vector<1x128xf32>
    %121 = vector.broadcast %120 : vector<1x128xf32> to vector<16x128xf32>
    %122 = arith.addf %119, %121 : vector<16x128xf32>
    %cst_118 = arith.constant 0.000000e+00 : f32
    %123 = vector.broadcast %cst_118 : f32 to vector<16x128xf32>
    %124 = arith.maximumf %122, %123 : vector<16x128xf32>
    %c8_119 = arith.constant 8 : index
    %c0_120 = arith.constant 0 : index
    %125 = vector.load %arg10[%c8_119, %c0_120] : memref<80x128xf32, #tpu.memory_space<vmem>>, vector<16x128xf32>
    tpu.vector_store %arg10[%c8_119, %c0_120], %124 {strides = array<i32>} : memref<80x128xf32, #tpu.memory_space<vmem>>, vector<16x128xf32>,
    %c24 = arith.constant 24 : index
    %c0_121 = arith.constant 0 : index
    %126 = vector.load %arg10[%c24, %c0_121] : memref<80x128xf32, #tpu.memory_space<vmem>>, vector<8x128xf32>
    tpu.vector_store %arg10[%c24, %c0_121], %0 {strides = array<i32>} : memref<80x128xf32, #tpu.memory_space<vmem>>, vector<8x128xf32>,
    %c5_122 = arith.constant 5 : index
    %c0_123 = arith.constant 0 : index
    %c0_124 = arith.constant 0 : index
    %127 = vector.load %arg3[%c5_122, %c0_123, %c0_124] : memref<7x384x128xbf16, #tpu.memory_space<vmem>>, vector<1x384x128xbf16>
    %128 = vector.shape_cast %127 : vector<1x384x128xbf16> to vector<384x128xbf16>
    %c7_125 = arith.constant 7 : index
    %c0_126 = arith.constant 0 : index
    %129 = vector.load %arg10[%c7_125, %c0_126] : memref<80x128xf32, #tpu.memory_space<vmem>>, vector<16x128xf32>
    %c8_127 = arith.constant 8 : index
    %c0_128 = arith.constant 0 : index
    %130 = vector.load %arg10[%c8_127, %c0_128] : memref<80x128xf32, #tpu.memory_space<vmem>>, vector<16x128xf32>
    %c9_129 = arith.constant 9 : index
    %c0_130 = arith.constant 0 : index
    %131 = vector.load %arg10[%c9_129, %c0_130] : memref<80x128xf32, #tpu.memory_space<vmem>>, vector<16x128xf32>
    %132 = tpu.concatenate %129, %130, %131 in 1 : vector<16x128xf32>, vector<16x128xf32>, vector<16x128xf32> -> vector<16x384xf32>
    %133 = arith.truncf %132 : vector<16x384xf32> to vector<16x384xbf16>
    %cst_131 = arith.constant dense<0.000000e+00> : vector<16x128xf32>
    %134 = tpu.matmul %133, %128, %cst_131 {dimension_numbers = #tpu.dot_dimension_numbers<[1], [0], [0], [1], [0, 0, 1, 1], [], []>} : vector<16x384xbf16>, vector<384x128xbf16>, vector<16x128xf32> -> vector<16x128xf32>
    %c6_132 = arith.constant 6 : index
    %c0_133 = arith.constant 0 : index
    %135 = vector.load %arg4[%c6_132, %c0_133] : memref<8x128xf32, #tpu.memory_space<vmem>>, vector<1x128xf32>
    %136 = vector.broadcast %135 : vector<1x128xf32> to vector<16x128xf32>
    %137 = arith.mulf %134, %136 : vector<16x128xf32>
    %c6_134 = arith.constant 6 : index
    %c0_135 = arith.constant 0 : index
    %138 = vector.load %arg5[%c6_134, %c0_135] : memref<8x128xf32, #tpu.memory_space<vmem>>, vector<1x128xf32>
    %139 = vector.broadcast %138 : vector<1x128xf32> to vector<16x128xf32>
    %140 = arith.addf %137, %139 : vector<16x128xf32>
    %cst_136 = arith.constant 0.000000e+00 : f32
    %141 = vector.broadcast %cst_136 : f32 to vector<16x128xf32>
    %142 = arith.maximumf %140, %141 : vector<16x128xf32>
    %c8_137 = arith.constant 8 : index
    %c0_138 = arith.constant 0 : index
    %143 = vector.load %arg9[%c8_137, %c0_138] : memref<80x128xf32, #tpu.memory_space<vmem>>, vector<16x128xf32>
    tpu.vector_store %arg9[%c8_137, %c0_138], %142 {strides = array<i32>} : memref<80x128xf32, #tpu.memory_space<vmem>>, vector<16x128xf32>,
    %c24_139 = arith.constant 24 : index
    %c0_140 = arith.constant 0 : index
    %144 = vector.load %arg9[%c24_139, %c0_140] : memref<80x128xf32, #tpu.memory_space<vmem>>, vector<8x128xf32>
    tpu.vector_store %arg9[%c24_139, %c0_140], %0 {strides = array<i32>} : memref<80x128xf32, #tpu.memory_space<vmem>>, vector<8x128xf32>,
    %c6_141 = arith.constant 6 : index
    %c0_142 = arith.constant 0 : index
    %c0_143 = arith.constant 0 : index
    %145 = vector.load %arg3[%c6_141, %c0_142, %c0_143] : memref<7x384x128xbf16, #tpu.memory_space<vmem>>, vector<1x384x128xbf16>
    %146 = vector.shape_cast %145 : vector<1x384x128xbf16> to vector<384x128xbf16>
    %c8_144 = arith.constant 8 : index
    %c0_145 = arith.constant 0 : index
    %147 = tpu.strided_load %arg9[%c8_144, %c0_145] {strides = array<i32: 2, 1>} : memref<80x128xf32, #tpu.memory_space<vmem>>, vector<6x128xf32>
    %c9_146 = arith.constant 9 : index
    %c0_147 = arith.constant 0 : index
    %148 = tpu.strided_load %arg9[%c9_146, %c0_147] {strides = array<i32: 2, 1>} : memref<80x128xf32, #tpu.memory_space<vmem>>, vector<6x128xf32>
    %149 = arith.maximumf %147, %148 : vector<6x128xf32>
    %c10_148 = arith.constant 10 : index
    %c0_149 = arith.constant 0 : index
    %150 = tpu.strided_load %arg9[%c10_148, %c0_149] {strides = array<i32: 2, 1>} : memref<80x128xf32, #tpu.memory_space<vmem>>, vector<6x128xf32>
    %c11_150 = arith.constant 11 : index
    %c0_151 = arith.constant 0 : index
    %151 = tpu.strided_load %arg9[%c11_150, %c0_151] {strides = array<i32: 2, 1>} : memref<80x128xf32, #tpu.memory_space<vmem>>, vector<6x128xf32>
    %152 = arith.maximumf %150, %151 : vector<6x128xf32>
    %c12 = arith.constant 12 : index
    %c0_152 = arith.constant 0 : index
    %153 = tpu.strided_load %arg9[%c12, %c0_152] {strides = array<i32: 2, 1>} : memref<80x128xf32, #tpu.memory_space<vmem>>, vector<6x128xf32>
    %c13 = arith.constant 13 : index
    %c0_153 = arith.constant 0 : index
    %154 = tpu.strided_load %arg9[%c13, %c0_153] {strides = array<i32: 2, 1>} : memref<80x128xf32, #tpu.memory_space<vmem>>, vector<6x128xf32>
    %155 = arith.maximumf %153, %154 : vector<6x128xf32>
    %156 = tpu.concatenate %149, %152, %155 in 1 : vector<6x128xf32>, vector<6x128xf32>, vector<6x128xf32> -> vector<6x384xf32>
    %157 = arith.truncf %156 : vector<6x384xf32> to vector<6x384xbf16>
    %cst_154 = arith.constant dense<0.000000e+00> : vector<6x128xf32>
    %158 = tpu.matmul %157, %146, %cst_154 {dimension_numbers = #tpu.dot_dimension_numbers<[1], [0], [0], [1], [0, 0, 1, 1], [], []>} : vector<6x384xbf16>, vector<384x128xbf16>, vector<6x128xf32> -> vector<6x128xf32>
    %c7_155 = arith.constant 7 : index
    %c0_156 = arith.constant 0 : index
    %159 = vector.load %arg4[%c7_155, %c0_156] : memref<8x128xf32, #tpu.memory_space<vmem>>, vector<1x128xf32>
    %160 = vector.broadcast %159 : vector<1x128xf32> to vector<6x128xf32>
    %161 = arith.mulf %158, %160 : vector<6x128xf32>
    %c7_157 = arith.constant 7 : index
    %c0_158 = arith.constant 0 : index
    %162 = vector.load %arg5[%c7_157, %c0_158] : memref<8x128xf32, #tpu.memory_space<vmem>>, vector<1x128xf32>
    %163 = vector.broadcast %162 : vector<1x128xf32> to vector<6x128xf32>
    %164 = arith.addf %161, %163 : vector<6x128xf32>
    %cst_159 = arith.constant 0.000000e+00 : f32
    %165 = vector.broadcast %cst_159 : f32 to vector<6x128xf32>
    %166 = arith.maximumf %164, %165 : vector<6x128xf32>
    %cst_160 = arith.constant dense<0xFF800000> : vector<128xf32>
    %167 = vector.multi_reduction <maximumf>, %166, %cst_160 [0] : vector<6x128xf32> to vector<128xf32>
    %168 = vector.shape_cast %167 : vector<128xf32> to vector<1x128xf32>
    %169 = arith.truncf %168 : vector<1x128xf32> to vector<1x128xbf16>
    %c0_161 = arith.constant 0 : index
    %c0_162 = arith.constant 0 : index
    %170 = vector.load %arg6[%c0_161, %c0_162] : memref<128x128xbf16, #tpu.memory_space<vmem>>, vector<128x128xbf16>
    %cst_163 = arith.constant dense<0.000000e+00> : vector<1x128xf32>
    %171 = tpu.matmul %169, %170, %cst_163 {dimension_numbers = #tpu.dot_dimension_numbers<[1], [0], [0], [1], [0, 0, 1, 1], [], []>} : vector<1x128xbf16>, vector<128x128xbf16>, vector<1x128xf32> -> vector<1x128xf32>
    %c0_164 = arith.constant 0 : index
    %c0_165 = arith.constant 0 : index
    %172 = vector.load %arg7[%c0_164, %c0_165] : memref<1x128xf32, #tpu.memory_space<vmem>>, vector<1x128xf32>
    %173 = arith.addf %171, %172 : vector<1x128xf32>
    %c0_166 = arith.constant 0 : index
    %c0_167 = arith.constant 0 : index
    %c0_168 = arith.constant 0 : index
    %174 = vector.load %arg8[%c0_166, %c0_167, %c0_168] : memref<1x1x128xf32, #tpu.memory_space<vmem>>, vector<1x1x128xf32>
    %175 = vector.shape_cast %174 : vector<1x1x128xf32> to vector<1x128xf32>
    %176 = vector.shape_cast %173 : vector<1x128xf32> to vector<1x1x128xf32>
    tpu.vector_store %arg8[%c0_166, %c0_167, %c0_168], %176 {strides = array<i32>} : memref<1x1x128xf32, #tpu.memory_space<vmem>>, vector<1x1x128xf32>,
    return
  }
  func.func @transform_0(%arg0: i32) -> (i32, i32, i32) {
    %c0_i32 = arith.constant 0 : i32
    %c0_i32_0 = arith.constant 0 : i32
    %c0_i32_1 = arith.constant 0 : i32
    return %arg0, %c0_i32, %c0_i32_0 : i32, i32, i32
  }
  func.func @transform_1(%arg0: i32) -> (i32, i32) {
    %c0_i32 = arith.constant 0 : i32
    %c0_i32_0 = arith.constant 0 : i32
    %c0_i32_1 = arith.constant 0 : i32
    return %c0_i32, %c0_i32_0 : i32, i32
  }
  func.func @transform_2(%arg0: i32) -> (i32, i32, i32) {
    %c0_i32 = arith.constant 0 : i32
    %c0_i32_0 = arith.constant 0 : i32
    %c0_i32_1 = arith.constant 0 : i32
    %c0_i32_2 = arith.constant 0 : i32
    return %c0_i32, %c0_i32_0, %c0_i32_1 : i32, i32, i32
  }
  func.func @transform_3(%arg0: i32) -> (i32, i32) {
    %c0_i32 = arith.constant 0 : i32
    %c0_i32_0 = arith.constant 0 : i32
    %c0_i32_1 = arith.constant 0 : i32
    return %c0_i32, %c0_i32_0 : i32, i32
  }
  func.func @transform_4(%arg0: i32) -> (i32, i32) {
    %c0_i32 = arith.constant 0 : i32
    %c0_i32_0 = arith.constant 0 : i32
    %c0_i32_1 = arith.constant 0 : i32
    return %c0_i32, %c0_i32_0 : i32, i32
  }
  func.func @transform_5(%arg0: i32) -> (i32, i32) {
    %c0_i32 = arith.constant 0 : i32
    %c0_i32_0 = arith.constant 0 : i32
    %c0_i32_1 = arith.constant 0 : i32
    return %c0_i32, %c0_i32_0 : i32, i32
  }
  func.func @transform_6(%arg0: i32) -> (i32, i32) {
    %c0_i32 = arith.constant 0 : i32
    %c0_i32_0 = arith.constant 0 : i32
    %c0_i32_1 = arith.constant 0 : i32
    return %c0_i32, %c0_i32_0 : i32, i32
  }
  func.func @transform_7(%arg0: i32) -> (i32, i32, i32) {
    %c0_i32 = arith.constant 0 : i32
    %c0_i32_0 = arith.constant 0 : i32
    %c0_i32_1 = arith.constant 0 : i32
    return %arg0, %c0_i32, %c0_i32_0 : i32, i32, i32
  }
}

</mosaic_0001>

<bundles_post_ra>
// kernel: squeeze.2
= control target key start
LH: loop header
LB: loop body
LE: loop exit
PB: predicated region body
PF: predicated region fallthrough
CT: control target
= control target key end

     0   :  { %vm81_vm0 = vcmask 261120   ;;  %vm192_vm1 = vcmask 1047556   ;;  %s391_s10 = smov 96   ;;  %s393_s14 = smov 32   ;;  %s644_s0 = inlined_call_operand.vmem [shape: f32[2,2048], index: 0, kind: input, shape index: {}]   ;;  %s645_s1 = inlined_call_operand.vmem [shape: f32[2,64,32], index: 1, kind: output, shape index: {}]  }
   0x1   :  { %v338_v0 = vld [vmem:[%s644_s0 + $0xe] sm:$0x3]  ;;  %v339_v1 = vld [vmem:[%s644_s0 + $0xc] sm:$0x3]  ;;  %v340_v2 = vld [vmem:[%s644_s0 + $0xa] sm:$0x3] }
   0x2   :  { %48 = vst [vmem:[#allocation0 + $0x38] sm:$0x3] %v338_v0  ;;  %53 = vst [vmem:[#allocation0 + $0x30] sm:$0x3] %v339_v1  ;;  %v341_v3 = vld [vmem:[%s644_s0 + $0x8] sm:$0x3] }
   0x3   :  { %58 = vst [vmem:[#allocation0 + $0x28] sm:$0x3] %v340_v2  ;;  %v342_v4 = vld [vmem:[%s644_s0 + $0x6] sm:$0x3]  ;;  %v343_v5 = vld [vmem:[%s644_s0 + $0x4] sm:$0x3] }
   0x4   :  { %63 = vst [vmem:[#allocation0 + $0x20] sm:$0x3] %v341_v3  ;;  %68 = vst [vmem:[#allocation0 + $0x18] sm:$0x3] %v342_v4  ;;  %v344_v6 = vld [vmem:[%s644_s0 + $0x2] sm:$0x3] }
   0x5   :  { %73 = vst [vmem:[#allocation0 + $0x10] sm:$0x3] %v343_v5  ;;  %v78_v7 = vld [vmem:[%s644_s0] sm:$0x3]  ;;  %77 = vst [vmem:[#allocation0 + $0x8] sm:$0x3] %v344_v6 }
   0x6   :  { %79 = vst [vmem:[#allocation0] sm:$0x3] %v78_v7  ;;  %v330_v8 = vld [vmem:[%s644_s0 + $0x1e] sm:$0x3]  ;;  %v331_v9 = vld [vmem:[%s644_s0 + $0x1c] sm:$0x3] }
   0x7   :  { %8 = vst [vmem:[#allocation0 + $0x78] sm:$0x3] %v330_v8  ;;  %13 = vst [vmem:[#allocation0 + $0x70] sm:$0x3] %v331_v9  ;;  %v332_v10 = vld [vmem:[%s644_s0 + $0x1a] sm:$0x3] }
   0x8   :  { %v333_v11 = vld [vmem:[%s644_s0 + $0x18] sm:$0x3]  ;;  %v334_v12 = vld [vmem:[%s644_s0 + $0x16] sm:$0x3]  ;;  %18 = vst [vmem:[#allocation0 + $0x68] sm:$0x3] %v332_v10 }
   0x9   :  { %23 = vst [vmem:[#allocation0 + $0x60] sm:$0x3] %v333_v11  ;;  %28 = vst [vmem:[#allocation0 + $0x58] sm:$0x3] %v334_v12  ;;  %v335_v13 = vld [vmem:[%s644_s0 + $0x14] sm:$0x3] }
   0xa   :  { %v336_v14 = vld [vmem:[%s644_s0 + $0x12] sm:$0x3]  ;;  %v337_v15 = vld [vmem:[%s644_s0 + $0x10] sm:$0x3]  ;;  %33 = vst [vmem:[#allocation0 + $0x50] sm:$0x3] %v335_v13 }
   0xb   :  { %38 = vst [vmem:[#allocation0 + $0x48] sm:$0x3] %v336_v14  ;;  %43 = vst [vmem:[#allocation0 + $0x40] sm:$0x3] %v337_v15  ;;  %v114_v16 = vld [vmem:[#allocation0 + $0x28] sm:$0x3]  }
   0xc   :  { %v121_v17 = vld [vmem:[#allocation0 + $0x30] sm:$0x3]   ;;  %v128_v18 = vld [vmem:[#allocation0 + $0x38] sm:$0x3]   ;;  %v107_v21 = vld [vmem:[#allocation0 + $0x20] sm:$0x3]  }
   0xd   :  { %v93_v19 = vld [vmem:[#allocation0 + $0x10] sm:$0x3]   ;;  %v100_v20 = vld [vmem:[#allocation0 + $0x18] sm:$0x3]   ;;  %354 = vst.msk [vmem:[%s645_s1 + $0x14] sm:$0x1] %vm81_vm0, %v114_v16  }
   0xe   :  { %355 = vst.msk [vmem:[%s645_s1 + $0x53] sm:$0x2] %vm81_vm0, %v114_v16   ;;  %356 = vst.msk [vmem:[%s645_s1 + $0x18] sm:$0x1] %vm81_vm0, %v121_v17   ;;  %v80_v22 = vld [vmem:[#allocation0] sm:$0x3]  }
   0xf   :  { %357 = vst.msk [vmem:[%s645_s1 + $0x57] sm:$0x2] %vm81_vm0, %v121_v17   ;;  %358 = vst.msk [vmem:[%s645_s1 + $0x1c] sm:$0x1] %vm81_vm0, %v128_v18   ;;  %v86_v23 = vld [vmem:[#allocation0 + $0x8] sm:$0x3]  }
  0x10   :  { %359 = vst.msk [vmem:[%s645_s1 + $0x5b] sm:$0x2] %vm81_vm0, %v128_v18   ;;  %348 = vst.msk [vmem:[%s645_s1 + $0x8] sm:$0x1] %vm81_vm0, %v93_v19   ;;  %v156_v27 = vld [vmem:[#allocation0 + $0x58] sm:$0x3]  }
  0x11   :  { %349 = vst.msk [vmem:[%s645_s1 + $0x47] sm:$0x2] %vm81_vm0, %v93_v19   ;;  %350 = vst.msk [vmem:[%s645_s1 + $0xc] sm:$0x1] %vm81_vm0, %v100_v20   ;;  %v163_v28 = vld [vmem:[#allocation0 + $0x60] sm:$0x3]  }
  0x12   :  { %351 = vst.msk [vmem:[%s645_s1 + $0x4b] sm:$0x2] %vm81_vm0, %v100_v20   ;;  %352 = vst.msk [vmem:[%s645_s1 + $0x10] sm:$0x1] %vm81_vm0, %v107_v21   ;;  %v170_v29 = vld [vmem:[#allocation0 + $0x68] sm:$0x3]  }
  0x13   :  { %353 = vst.msk [vmem:[%s645_s1 + $0x4f] sm:$0x2] %vm81_vm0, %v107_v21   ;;  %82 = vst.msk [vmem:[%s645_s1] sm:$0x1] %vm81_vm0, %v80_v22   ;;  %v135_v30 = vld [vmem:[#allocation0 + $0x40] sm:$0x3]  }
  0x14   :  { %345 = vst.msk [vmem:[%s645_s1 + $0x3f] sm:$0x2] %vm81_vm0, %v80_v22   ;;  %346 = vst.msk [vmem:[%s645_s1 + $0x4] sm:$0x1] %vm81_vm0, %v86_v23   ;;  %v142_v31 = vld [vmem:[#allocation0 + $0x48] sm:$0x3]  }
  0x15   :  { %347 = vst.msk [vmem:[%s645_s1 + $0x43] sm:$0x2] %vm81_vm0, %v86_v23   ;;  %v190_v24 = vld [vmem:[#allocation0] ss:$8 sm:$0xf]  }
  0x16   :  { %v191_v25 = vld [vmem:[#allocation0] ss:$8 sm:$0xf0]   ;;  %366 = vst.msk [vmem:[%s645_s1 + $0x2c] sm:$0x1] %vm81_vm0, %v156_v27  }
  0x17   :  { %v193_v26 = vsel %vm192_vm1, %v191_v25, %v190_v24  ;;  %v149_v32 = vld [vmem:[#allocation0 + $0x50] sm:$0x3]   ;;  %367 = vst.msk [vmem:[%s645_s1 + $0x6b] sm:$0x2] %vm81_vm0, %v156_v27   ;;  %368 = vst.msk [vmem:[%s645_s1 + $0x30] sm:$0x1] %vm81_vm0, %v163_v28  }
  0x18   :  { %194 = vrot.lane.b32.xlu0 %v193_v26, %s391_s10  ;;  %369 = vst.msk [vmem:[%s645_s1 + $0x6f] sm:$0x2] %vm81_vm0, %v163_v28   ;;  %370 = vst.msk [vmem:[%s645_s1 + $0x34] sm:$0x1] %vm81_vm0, %v170_v29   ;;  %v177_v33 = vld [vmem:[#allocation0 + $0x70] sm:$0x3]  }
  0x19   :  { %371 = vst.msk [vmem:[%s645_s1 + $0x73] sm:$0x2] %vm81_vm0, %v170_v29   ;;  %360 = vst.msk [vmem:[%s645_s1 + $0x20] sm:$0x1] %vm81_vm0, %v135_v30   ;;  %v184_v36 = vld [vmem:[#allocation0 + $0x78] sm:$0x3]  }
  0x1a   :  { %361 = vst.msk [vmem:[%s645_s1 + $0x5f] sm:$0x2] %vm81_vm0, %v135_v30   ;;  %362 = vst.msk [vmem:[%s645_s1 + $0x24] sm:$0x1] %vm81_vm0, %v142_v31  }
  0x1b   :  { %363 = vst.msk [vmem:[%s645_s1 + $0x63] sm:$0x2] %vm81_vm0, %v142_v31   ;;  %364 = vst.msk [vmem:[%s645_s1 + $0x28] sm:$0x1] %vm81_vm0, %v149_v32  }
  0x1c   :  { %365 = vst.msk [vmem:[%s645_s1 + $0x67] sm:$0x2] %vm81_vm0, %v149_v32   ;;  %v211_v34 = vld [vmem:[#allocation0 + $0x40] ss:$8 sm:$0xf]  }
  0x1d   :  { %372 = vst.msk [vmem:[%s645_s1 + $0x38] sm:$0x1] %vm81_vm0, %v177_v33   ;;  %373 = vst.msk [vmem:[%s645_s1 + $0x77] sm:$0x2] %vm81_vm0, %v177_v33  }
  0x1e   :  { %v213_v35 = vld [vmem:[#allocation0 + $0x40] ss:$8 sm:$0xf0]   ;;  %374 = vst.msk [vmem:[%s645_s1 + $0x3c] sm:$0x1] %vm81_vm0, %v184_v36  }
  0x1f   :  { %v215_v37 = vsel %vm192_vm1, %v213_v35, %v211_v34  ;;  %375 = vst.msk [vmem:[%s645_s1 + $0x7b] sm:$0x2] %vm81_vm0, %v184_v36   ;;  %v200_v38 = vld [vmem:[#allocation0 + $0x1] ss:$8 sm:$0xf]  }
  0x20   :  { %v202_v39 = vld [vmem:[#allocation0 + $0x1] ss:$8 sm:$0xf0]   ;;  %216 = vrot.lane.b32.xlu1 %v215_v37, %s391_s10  ;;  %v232_v44 = vld [vmem:[#allocation0] ss:$8 sm:$0xf]  }
  0x21   :  { %v204_v40 = vsel %vm192_vm1, %v202_v39, %v200_v38  ;;  %v222_v41 = vld [vmem:[#allocation0 + $0x41] ss:$8 sm:$0xf]   ;;  %v233_v45 = vld [vmem:[#allocation0] ss:$8 sm:$0xf0]  }
  0x22   :  { %v224_v42 = vld [vmem:[#allocation0 + $0x41] ss:$8 sm:$0xf0]   ;;  %205 = vrot.lane.b32.xlu0 %v204_v40, %s391_s10  ;;  %v235_v46 = vsel %vm192_vm1, %v233_v45, %v232_v44  ;;  %v253_v49 = vld [vmem:[#allocation0 + $0x40] ss:$8 sm:$0xf]  }
  0x23   :  { %v226_v43 = vsel %vm192_vm1, %v224_v42, %v222_v41  ;;  %v242_v47 = vld [vmem:[#allocation0 + $0x1] ss:$8 sm:$0xf]   ;;  %v255_v50 = vld [vmem:[#allocation0 + $0x40] ss:$8 sm:$0xf0]  }
  0x24   :  { %v244_v48 = vld [vmem:[#allocation0 + $0x1] ss:$8 sm:$0xf0]   ;;  %227 = vrot.lane.b32.xlu1 %v226_v43, %s391_s10  ;;  %s392_s10 = smov 64   ;;  %v257_v52 = vsel %vm192_vm1, %v255_v50, %v253_v49 }
  0x25   :  { %v246_v51 = vsel %vm192_vm1, %v244_v48, %v242_v47  ;;  %v264_v53 = vld [vmem:[#allocation0 + $0x41] ss:$8 sm:$0xf]   ;;  %v274_v55 = vld [vmem:[#allocation0] ss:$8 sm:$0xf]  }
  0x26   :  { %236 = vrot.lane.b32.xlu0 %v235_v46, %s392_s10  ;;  %v266_v54 = vld [vmem:[#allocation0 + $0x41] ss:$8 sm:$0xf0]   ;;  %v275_v56 = vld [vmem:[#allocation0] ss:$8 sm:$0xf0]  }
  0x27   :  { %v268_v57 = vsel %vm192_vm1, %v266_v54, %v264_v53  ;;  %v277_v58 = vsel %vm192_vm1, %v275_v56, %v274_v55  ;;  %v284_v59 = vld [vmem:[#allocation0 + $0x1] ss:$8 sm:$0xf]   ;;  %v295_v61 = vld [vmem:[#allocation0 + $0x40] ss:$8 sm:$0xf]  }
  0x28   :  { %247 = vrot.lane.b32.xlu1 %v246_v51, %s392_s10  ;;  %v286_v60 = vld [vmem:[#allocation0 + $0x1] ss:$8 sm:$0xf0]   ;;  %v297_v62 = vld [vmem:[#allocation0 + $0x40] ss:$8 sm:$0xf0]  }
  0x29   :  { %v288_v63 = vsel %vm192_vm1, %v286_v60, %v284_v59  ;;  %v299_v0 = vsel %vm192_vm1, %v297_v62, %v295_v61  ;;  %v306_v1 = vld [vmem:[#allocation0 + $0x41] ss:$8 sm:$0xf]  }
  0x2a   :  { %258 = vrot.lane.b32.xlu0 %v257_v52, %s392_s10  ;;  %v308_v2 = vld [vmem:[#allocation0 + $0x41] ss:$8 sm:$0xf0]  }
  0x2b   :  { %v310_v3 = vsel %vm192_vm1, %v308_v2, %v306_v1 }
  0x2c   :  { %269 = vrot.lane.b32.xlu1 %v268_v57, %s392_s10 }
  0x2e   :  { %278 = vrot.lane.b32.xlu0 %v277_v58, %s393_s14 }
  0x30   :  { %289 = vrot.lane.b32.xlu1 %v288_v63, %s393_s14 }
  0x32   :  { %300 = vrot.lane.b32.xlu0 %v299_v0, %s393_s14 }
  0x34   :  { %311 = vrot.lane.b32.xlu1 %v310_v3, %s393_s14 }
  0x8a   :  { %v195_v4 = vpop.permute.xlu0 %194  }
  0x8b   :  { %376 = vst.msk [vmem:[%s645_s1 + $0x1] ss:$4 sm:$0xff] %vm81_vm0, %v195_v4  }
  0x92   :  { %v217_v5 = vpop.permute.xlu1 %216  }
  0x93   :  { %378 = vst.msk [vmem:[%s645_s1 + $0x21] ss:$4 sm:$0xff] %vm81_vm0, %v217_v5  }
  0x94   :  { %v206_v6 = vpop.permute.xlu0 %205  }
  0x95   :  { %377 = vst.msk [vmem:[%s645_s1 + $0x41] ss:$4 sm:$0xff] %vm81_vm0, %v206_v6  }
  0x96   :  { %v228_v7 = vpop.permute.xlu1 %227  }
  0x97   :  { %379 = vst.msk [vmem:[%s645_s1 + $0x61] ss:$4 sm:$0xff] %vm81_vm0, %v228_v7  }
  0x98   :  { %v237_v8 = vpop.permute.xlu0 %236  }
  0x99   :  { %380 = vst.msk [vmem:[%s645_s1 + $0x2] ss:$4 sm:$0xff] %vm81_vm0, %v237_v8  }
  0x9a   :  { %v248_v9 = vpop.permute.xlu1 %247  }
  0x9b   :  { %381 = vst.msk [vmem:[%s645_s1 + $0x42] ss:$4 sm:$0xff] %vm81_vm0, %v248_v9  }
  0x9c   :  { %v259_v10 = vpop.permute.xlu0 %258  }
  0x9d   :  { %382 = vst.msk [vmem:[%s645_s1 + $0x22] ss:$4 sm:$0xff] %vm81_vm0, %v259_v10  }
  0x9e   :  { %v270_v11 = vpop.permute.xlu1 %269  }
  0x9f   :  { %383 = vst.msk [vmem:[%s645_s1 + $0x62] ss:$4 sm:$0xff] %vm81_vm0, %v270_v11  }
  0xa0   :  { %v279_v12 = vpop.permute.xlu0 %278  }
  0xa1   :  { %384 = vst.msk [vmem:[%s645_s1 + $0x3] ss:$4 sm:$0xff] %vm81_vm0, %v279_v12  }
  0xa2   :  { %v290_v13 = vpop.permute.xlu1 %289  }
  0xa3   :  { %385 = vst.msk [vmem:[%s645_s1 + $0x43] ss:$4 sm:$0xff] %vm81_vm0, %v290_v13  }
  0xa4   :  { %v301_v14 = vpop.permute.xlu0 %300  }
  0xa5   :  { %386 = vst.msk [vmem:[%s645_s1 + $0x23] ss:$4 sm:$0xff] %vm81_vm0, %v301_v14  }
  0xa6   :  { %v312_v15 = vpop.permute.xlu1 %311  }
  0xa7   :  { %387 = vst.msk [vmem:[%s645_s1 + $0x63] ss:$4 sm:$0xff] %vm81_vm0, %v312_v15  }

// kernel: audionet_forward.1
= control target key start
LH: loop header
LB: loop body
LE: loop exit
PB: predicated region body
PF: predicated region fallthrough
CT: control target
= control target key end

     0   :  { %12 = vsyncpa [#allocation5], 0  ;;  %s5133_s0 = inlined_call_operand.vmem [shape: f32[2,80,128], index: 0, kind: input, shape index: {}]   ;;  %s5134_s1 = inlined_call_operand.vmem [shape: bf16[640,128], index: 1, kind: input, shape index: {}]   ;;  %s5135_s2 = inlined_call_operand.hbm [shape: bf16[7,384,128], index: 2, kind: input, shape index: {}]   ;;  %s5136_s3 = inlined_call_operand.vmem [shape: f32[8,128], index: 3, kind: input, shape index: {}]   ;;  %s5137_s4 = inlined_call_operand.vmem [shape: f32[8,128], index: 4, kind: input, shape index: {}]   ;;  %s5138_s5 = inlined_call_operand.vmem [shape: bf16[128,128], index: 5, kind: input, shape index: {}]   ;;  %s5139_s6 = inlined_call_operand.vmem [shape: f32[1,128], index: 6, kind: input, shape index: {}]   ;;  %s5140_s7 = inlined_call_operand.hbm [shape: f32[2,1,128], index: 7, kind: output, shape index: {}]  }
   0x1   :  { %13 = vsyncpa [#allocation6], 0 }
   0x2   :  { %15 = vsyncpa [#allocation6 + $0x1], 0  ;;  %s4690_s24 = smov 0   ;;  %s4692_s25 = smov 0  }
   0x3   :  { %s4694_s26 = smov 0   ;;  %s4696_s27 = smov 0  }
   0x4 LB: > { %s4711_s28 = sadd.s32 4294967295, %s4642_s27   ;;  %s3486_s29 = sadd.s32 4294967294, %s4642_s27   ;;  %s4642_s27 = sphi %s4696_s27, %s5156_s27   ;;  %s4638_s26 = sphi %s4694_s26, %s5155_s26   ;;  %s4634_s25 = sphi %s4692_s25, %s5154_s25   ;;  %s4630_s24 = sphi %s4690_s24, %s5153_s24  }
   0x5   : > { %s4715_s30 = sadd.s32 1, %s4642_s27   ;;  %s180_s8 = sadd.s32 1, %s4638_s26 }
   0x6   : > { %s177_s9 = ssub.s32 %s4642_s27, %s4715_s30  ;;  %p190_p0 = scmp.ne.s32.totalorder %s4638_s26, %s4634_s25 }
   0x7   : > { %p178_p1 = scmp.eq.s32.totalorder %s177_s9, 0  ;;  %p191_p2 = scmp.eq.s32.totalorder %s4711_s28, 1 }
   0x8   : > { %p196_p3 = scmp.ne.s32.totalorder %s4634_s25, %s4630_s24  ;;  %p197_p4 = scmp.eq.s32.totalorder %s3486_s29, 1 }
   0x9   : > { %s4726_s10 = scalar_select %p178_p1, %s4638_s26, %s180_s8  }
   0xa   : > { %p4728_p5 = por %p191_p2, %p190_p0  ;;  %p4732_p6 = por %p197_p4, %p196_p3 }
   0xb   : > { %p3487_p7 = scmp.ge.s32.totalorder %s4642_s27, 1  ;;  %p204_p8 = scmp.lt.s32.totalorder %s4642_s27, 3 }
   0xc   : > { %s5144_s11 = scalar_select %p4728_p5, 1, 0 }
   0xd   : > { %s5145_s12 = scalar_select %p4732_p6, 1, 0 }
   0xe   : > { %p5141_p9 = scmp.eq.s32.totalorder %s4711_s28, 0  ;;  %p4739_p10 = pnand %p3487_p7, %p204_p8 }
   0xf   : > { %s4644_s14 = smov [#allocation4]   ;;  %s4548_s19 = scalar_lea.hbm %s5135_s2, 21504 }
  0x10   : > { %s5146_s13 = scalar_select %p4739_p10, 1, 0 }
  0x11   : > { %s219_s15 = sshll.u32 %s4644_s14, 4  ;;  %p4283_p11 = pneg %p4739_p10  ;;  %s220_s15 = int_to_ptr.vmem [resolvable:$true] %s219_s15 }
  0x12   : > { %p4549_p13 = scmp.ne.s32.totalorder %s5135_s2, %s4548_s19  ;;  %p4555_p3 = scmp.lt.u32.totalorder %s4548_s19, %s5135_s2 }
  0x13   : > { %p4747_p12 = pnand %p5141_p9, %p4283_p11 }
  0x15   : > { %p4550_p0 = pneg %p4747_p12 }
  0x17   : > { %p4551_p1 = pnand %p4550_p0, %p4549_p13 }
  0x19   : > { %p4552_p2 = pneg %p4551_p1 }
  0x1b   : > { %p4557_p4 = pnand %p4555_p3, %p4552_p2 }
  0x1d   : > { %4560 = shalt.err (!%p4557_p4)
}
  0x1e   : > { %s4561_s29 = scalar_lea.vmem %s220_s15, 21504  ;;  %p4569_p9 = scmp.lt.s32.totalorder %s220_s15, %s220_s15 }
  0x1f   : > { %p4562_p7 = scmp.ne.s32.totalorder %s220_s15, %s4561_s29  ;;  %p4570_p6 = scmp.lt.s32.totalorder %s4561_s29, %s4561_s29 }
  0x21   : > { %p4564_p8 = pnand %p4562_p7, %p4550_p0  ;;  %p4571_p5 = por %p4570_p6, %p4569_p9 }
  0x23   : > { %p4565_p11 = pneg %p4564_p8 }
  0x25   : > { %p4572_p10 = pnand %p4571_p5, %p4565_p11 }
  0x27   : > { %4575 = shalt.err (!%p4572_p10)
}
  0x28   : > { %s4645_s8 = smov 64   ;;  %s4646_s9 = smov 4  }
  0x29   : > { %4286 = dma.hbm_to_vmem [thread:$0]  (!%p4747_p12), %s5135_s2, 21504, %s220_s15, [#allocation5], %s4645_s8, %s4645_s8, %s4646_s9  }
  0x2a   : > { %p5148_p13 = scmp.ne.s32.totalorder %s5146_s13, 0 }
  0x2b   : > { %p5149_p1 = scmp.eq.s32.totalorder (!%p5148_p13), %s4711_s28, 0 }
  0x2c   : > { %255 = sbr.rel (%p5148_p13) target bundleno = 2270 (0x8de), region = 48 }
  0x33   : > { %4621 = dma.done.wait (%p5149_p1), [#allocation5], 21504   ;;  %p5150_p0 = pmov %p5149_p1 }
  0x34   : > { %v4331_v0 = vld [vmem:[%s5134_s1 + $0x40] sm:$0xff]   ;;  %v4335_v4 = vld [vmem:[%s5134_s1 + $0x48] sm:$0xff]   ;;  %v4339_v8 = vld [vmem:[%s5134_s1 + $0x50] sm:$0xff]   ;;  %p286_p5 = scmp.lt.s32.totalorder %s4711_s28, 1  ;;  %vm4648_vm0 = vmmov 0   ;;  %vm3291_vm1 = vcmask 1045504  }
  0x35   : > { %4623 = vsyncadd (%p5150_p0), [#allocation5], 4294945792  ;;  %v4332_v1 = vld [vmem:[%s5134_s1 + $0xc0] sm:$0xff]   ;;  %3728 = vmatprep.subr.bf16.mxu0 %v4331_v0  ;;  %v4336_v5 = vld [vmem:[%s5134_s1 + $0xc8] sm:$0xff]   ;;  %s284_s22 = sand.u32 1, %s4634_s25   ;;  %s3725_s14 = sshll.u32 %s4711_s28, 4 }
  0x36   : > { %v4333_v2 = vld [vmem:[%s5134_s1] sm:$0xff]   ;;  %3768 = vmatprep.subr.bf16.mxu1 %v4332_v1  ;;  %v4337_v6 = vld [vmem:[%s5134_s1 + $0x8] sm:$0xff]   ;;  %v4340_v9 = vld [vmem:[%s5134_s1 + $0xd0] sm:$0xff]   ;;  %s287_s20 = scalar_select %p286_p5, %s4711_s28, 1 }
  0x37   : > { %v4334_v3 = vld [vmem:[%s5134_s1 + $0x80] sm:$0xff]   ;;  %3729 = vmatpush3.bf16.msra.mxu0 %v4333_v2  ;;  %v4338_v7 = vld [vmem:[%s5134_s1 + $0x88] sm:$0xff]   ;;  %v4341_v10 = vld [vmem:[%s5134_s1 + $0x10] sm:$0xff]   ;;  %s285_s17 = scalar_lea.vmem [#allocation7], %s284_s22  ;;  %s3407_s21 = scalar_lea.sflag [#allocation6], %s284_s22 }
  0x38   : > { %3769 = vmatpush3.bf16.msra.mxu1 %v4334_v3  ;;  %3730 = vmatprep.subr.bf16.mxu0 %v4335_v4  ;;  %v4342_v11 = vld [vmem:[%s5134_s1 + $0x90] sm:$0xff]   ;;  %v4343_v12 = vld [vmem:[%s5134_s1 + $0x58] sm:$0xff]   ;;  %v4347_v16 = vld [vmem:[%s5134_s1 + $0x60] sm:$0xff]   ;;  %s4276_s9 = smul.u32 80, %s287_s20  ;;  %p5151_p9 = scmp.ne.s32.totalorder %s5144_s11, 0 }
  0x39   : > { %3770 = vmatprep.subr.bf16.mxu1 %v4336_v5  ;;  %v4344_v13 = vld [vmem:[%s5134_s1 + $0xd8] sm:$0xff]   ;;  %v4348_v17 = vld [vmem:[%s5134_s1 + $0xe0] sm:$0xff]   ;;  %v4351_v20 = vld [vmem:[%s5134_s1 + $0x68] sm:$0xff]   ;;  %s4649_s16 = smov [#allocation7]  }
  0x3a   : > { %v4345_v14 = vld [vmem:[%s5134_s1 + $0x18] sm:$0xff]   ;;  %v4349_v18 = vld [vmem:[%s5134_s1 + $0x20] sm:$0xff]   ;;  %v4352_v21 = vld [vmem:[%s5134_s1 + $0xe8] sm:$0xff]   ;;  %s4868_s23 = scalar_lea.vmem %s5133_s0, %s4276_s9  ;;  %s3419_s9 = sshll.u32 %s285_s17, 4  ;;  %s5093_s9 = int_to_ptr.vmem [resolvable:$true] %s3419_s9 }
  0x3b   : > { %3731 = vmatpush3.bf16.msra.mxu0 %v4337_v6  ;;  %v4346_v15 = vld [vmem:[%s5134_s1 + $0x98] sm:$0xff]   ;;  %v4350_v19 = vld [vmem:[%s5134_s1 + $0xa0] sm:$0xff]   ;;  %v4353_v22 = vld [vmem:[%s5134_s1 + $0x28] sm:$0xff]   ;;  %s4576_s28 = scalar_lea.vmem %s5093_s9, 16  ;;  %s4580_s15 = sshll.u32 %s4649_s16, 4  ;;  %s4581_s15 = int_to_ptr.vmem [resolvable:$false] %s4580_s15 }
  0x3c   : > { %3771 = vmatpush3.bf16.msra.mxu1 %v4338_v7  ;;  %3732 = vmatprep.subr.bf16.mxu0 %v4339_v8  ;;  %v4354_v23 = vld [vmem:[%s5134_s1 + $0xa8] sm:$0xff]   ;;  %v4355_v24 = vld [vmem:[%s5134_s1 + $0x70] sm:$0xff]   ;;  %v4359_v28 = vld [vmem:[%s5134_s1 + $0x78] sm:$0xff]   ;;  %p4577_p6 = scmp.ne.s32.totalorder %s5093_s9, %s4576_s28  ;;  %s4582_s13 = scalar_lea.vmem %s4581_s15, 32 }
  0x3d   : > { %3772 = vmatprep.subr.bf16.mxu1 %v4340_v9  ;;  %v4356_v25 = vld [vmem:[%s5134_s1 + $0xf0] sm:$0xff]   ;;  %v4360_v29 = vld [vmem:[%s5134_s1 + $0xf8] sm:$0xff]   ;;  %v382_v32 = vld [vmem:[%s4868_s23 + $0x7] sm:$0xff]  ;;  %p4583_p2 = scmp.lt.s32.totalorder %s5093_s9, %s4581_s15  ;;  %p4584_p3 = scmp.lt.s32.totalorder %s4582_s13, %s4576_s28 }
  0x3e   : > { %v4357_v26 = vld [vmem:[%s5134_s1 + $0x30] sm:$0xff]   ;;  %v4361_v30 = vld [vmem:[%s5134_s1 + $0x38] sm:$0xff]   ;;  %v374_v37 = vld [vmem:[%s4868_s23 + $0x6] sm:$0xff]  ;;  %p4578_p10 = pnand %p4577_p6, %p5151_p9 }
  0x3f   : > { %3733 = vmatpush3.bf16.msra.mxu0 %v4341_v10  ;;  %v4358_v27 = vld [vmem:[%s5134_s1 + $0xb0] sm:$0xff]   ;;  %v4362_v31 = vld [vmem:[%s5134_s1 + $0xb8] sm:$0xff]   ;;  %v390_v41 = vld [vmem:[%s4868_s23 + $0x8] sm:$0xff]  ;;  %p4585_p4 = por %p4584_p3, %p4583_p2 }
  0x40   : > { %3773 = vmatpush3.bf16.msra.mxu1 %v4342_v11  ;;  %3734 = vmatprep.subr.bf16.mxu0 %v4343_v12  ;;  %v383_v33 = vld [vmem:[%s4868_s23 + $0xf] sm:$0xff]  ;;  %v4363_v44 = vld [vmem:[%s5134_s1 + $0x100] sm:$0xff]   ;;  %v384_v46 = vld [vmem:[%s4868_s23 + $0x17] sm:$0xff]  ;;  %p4579_p12 = pneg %p4578_p10 }
  0x41   : > { %3774 = vmatprep.subr.bf16.mxu1 %v4344_v13  ;;  %v398_v34 = vld [vmem:[%s4868_s23 + $0x9] sm:$0xff]  ;;  %v415_v35 = vpack.c.bf16 %v383_v33, %v382_v32  ;;  %v399_v36 = vld [vmem:[%s4868_s23 + $0x11] sm:$0xff]  ;;  %v385_v47 = vld [vmem:[%s4868_s23 + $0x1f] sm:$0xff] }
  0x42   : > { %v375_v38 = vld [vmem:[%s4868_s23 + $0xe] sm:$0xff]  ;;  %v417_v39 = vpack.c.bf16 %v399_v36, %v398_v34  ;;  %v400_v48 = vld [vmem:[%s4868_s23 + $0x19] sm:$0xff]  ;;  %v401_v49 = vld [vmem:[%s4868_s23 + $0x21] sm:$0xff]  ;;  %v420_v50 = vpack.c.bf16 %v385_v47, %v384_v46  ;;  %p4586_p7 = pnand %p4585_p4, %p4579_p12 }
  0x43   : > { %3735 = vmatpush3.bf16.msra.mxu0 %v4345_v14  ;;  %v414_v40 = vpack.c.bf16 %v375_v38, %v374_v37  ;;  %v391_v42 = vld [vmem:[%s4868_s23 + $0x10] sm:$0xff]  ;;  %706 = vmatprep.mubr.bf16.mxu0 %v415_v35  ;;  %v4364_v45 = vld [vmem:[%s5134_s1 + $0x108] sm:$0xff]   ;;  %v422_v51 = vpack.c.bf16 %v401_v49, %v400_v48  ;;  %v377_v53 = vld [vmem:[%s4868_s23 + $0x1e] sm:$0xff] }
  0x44   : > { %3775 = vmatpush3.bf16.msra.mxu1 %v4346_v15  ;;  %3736 = vmatprep.subr.bf16.mxu0 %v4347_v16  ;;  %v416_v43 = vpack.c.bf16 %v391_v42, %v390_v41  ;;  %v376_v52 = vld [vmem:[%s4868_s23 + $0x16] sm:$0xff]  ;;  %v393_v55 = vld [vmem:[%s4868_s23 + $0x20] sm:$0xff]  ;;  %v402_v62 = vld [vmem:[%s4868_s23 + $0x29] sm:$0xff] }
  0x45   : > { %3776 = vmatprep.subr.bf16.mxu1 %v4348_v17  ;;  %771 = vmatprep.mubr.bf16.mxu1 %v417_v39  ;;  %v392_v54 = vld [vmem:[%s4868_s23 + $0x18] sm:$0xff]  ;;  %v419_v56 = vpack.c.bf16 %v377_v53, %v376_v52  ;;  %v4365_v57 = vld [vmem:[%s5134_s1 + $0x110] sm:$0xff]   ;;  %v386_v59 = vld [vmem:[%s4868_s23 + $0x27] sm:$0xff]  ;;  %v4647_v53 = vmov 0.0  }
  0x46   : > { %v421_v58 = vpack.c.bf16 %v393_v55, %v392_v54  ;;  %v387_v60 = vld [vmem:[%s4868_s23 + $0x2f] sm:$0xff]  ;;  %v4366_v0 = vld [vmem:[%s5134_s1 + $0x118] sm:$0xff]   ;;  %v378_v2 = vld [vmem:[%s4868_s23 + $0x26] sm:$0xff]  ;;  %292 = vst [vmem:[#allocation2] sm:$0xff] %v4647_v53 }
  0x47   : > { %3737 = vmatpush3.bf16.msra.mxu0 %v4349_v18  ;;  %v425_v61 = vpack.c.bf16 %v387_v60, %v386_v59  ;;  %v403_v63 = vld [vmem:[%s4868_s23 + $0x31] sm:$0xff]  ;;  %v394_v4 = vld [vmem:[%s4868_s23 + $0x28] sm:$0xff]  ;;  %v389_v7 = vld [vmem:[%s4868_s23 + $0x3f] sm:$0xff]  ;;  %293 = vst [vmem:[#allocation3] sm:$0xff] %v4647_v53 }
  0x48   : > { %3777 = vmatpush3.bf16.msra.mxu1 %v4350_v19  ;;  %3738 = vmatprep.subr.bf16.mxu0 %v4351_v20  ;;  %v427_v1 = vpack.c.bf16 %v403_v63, %v402_v62  ;;  %v379_v3 = vld [vmem:[%s4868_s23 + $0x2e] sm:$0xff]  ;;  %v388_v6 = vld [vmem:[%s4868_s23 + $0x37] sm:$0xff]  ;;  %v4367_v8 = vld [vmem:[%s5134_s1 + $0x120] sm:$0xff]   ;;  %903 = vst [vmem:[#allocation2 + $0x48] sm:$0xff] %v4647_v53 }
  0x49   : > { %3778 = vmatprep.subr.bf16.mxu1 %v4352_v21  ;;  %v395_v5 = vld [vmem:[%s4868_s23 + $0x30] sm:$0xff]  ;;  %v404_v9 = vld [vmem:[%s4868_s23 + $0x39] sm:$0xff]  ;;  %v405_v10 = vld [vmem:[%s4868_s23 + $0x41] sm:$0xff]  ;;  %v424_v11 = vpack.c.bf16 %v379_v3, %v378_v2  ;;  %v430_v13 = vpack.c.bf16 %v389_v7, %v388_v6  ;;  %1304 = vst [vmem:[#allocation3 + $0x48] sm:$0xff] %v4647_v53 }
  0x4a   : > { %v426_v12 = vpack.c.bf16 %v395_v5, %v394_v4  ;;  %v432_v14 = vpack.c.bf16 %v405_v10, %v404_v9  ;;  %v4368_v15 = vld [vmem:[%s5134_s1 + $0x128] sm:$0xff]   ;;  %v380_v16 = vld [vmem:[%s4868_s23 + $0x36] sm:$0xff]  ;;  %v381_v17 = vld [vmem:[%s4868_s23 + $0x3e] sm:$0xff] }
  0x4b   : > { %3739 = vmatpush3.bf16.msra.mxu0 %v4353_v22  ;;  %v396_v18 = vld [vmem:[%s4868_s23 + $0x38] sm:$0xff]  ;;  %v397_v19 = vld [vmem:[%s4868_s23 + $0x40] sm:$0xff]  ;;  %v406_v20 = vld [vmem:[%s4868_s23 + $0xa] sm:$0xff] }
  0x4c   : > { %3779 = vmatpush3.bf16.msra.mxu1 %v4354_v23  ;;  %3740 = vmatprep.subr.bf16.mxu0 %v4355_v24  ;;  %v4369_v21 = vld [vmem:[%s5134_s1 + $0x130] sm:$0xff]   ;;  %v429_v23 = vpack.c.bf16 %v381_v17, %v380_v16  ;;  %v431_v24 = vpack.c.bf16 %v397_v19, %v396_v18  ;;  %v412_v33 = vld [vmem:[%s4868_s23 + $0x3a] sm:$0xff]  ;;  %v413_v34 = vld [vmem:[%s4868_s23 + $0x42] sm:$0xff] }
  0x4d   : > { %3780 = vmatprep.subr.bf16.mxu1 %v4356_v25  ;;  %v407_v22 = vld [vmem:[%s4868_s23 + $0x12] sm:$0xff]  ;;  %v433_v35 = vpack.c.bf16 %v413_v34, %v412_v33  ;;  %v4371_v36 = vld [vmem:[#allocation4 + $0x40] sm:$0xff]   ;;  %v4373_v38 = vld [vmem:[#allocation4 + $0x48] sm:$0xff]  }
  0x4e   : > { %v4370_v25 = vld [vmem:[%s5134_s1 + $0x138] sm:$0xff]   ;;  %v4372_v37 = vld [vmem:[#allocation4] sm:$0xff]   ;;  %v4374_v39 = vld [vmem:[#allocation4 + $0x8] sm:$0xff]  }
  0x4f   : > { %3741 = vmatpush3.bf16.msra.mxu0 %v4357_v26  ;;  %v418_v26 = vpack.c.bf16 %v407_v22, %v406_v20  ;;  %v4376_v41 = vld [vmem:[#allocation4 + $0x50] sm:$0xff]   ;;  %v4382_v47 = vld [vmem:[#allocation4 + $0x60] sm:$0xff]   ;;  %v4384_v49 = vld [vmem:[#allocation4 + $0x98] sm:$0xff]  }
  0x50   : > { %3781 = vmatpush3.bf16.msra.mxu1 %v4358_v27  ;;  %3742 = vmatprep.subr.bf16.mxu0 %v4359_v28  ;;  %v408_v27 = vld [vmem:[%s4868_s23 + $0x1a] sm:$0xff]  ;;  %v409_v28 = vld [vmem:[%s4868_s23 + $0x22] sm:$0xff]  ;;  %v4377_v42 = vld [vmem:[#allocation4 + $0x10] sm:$0xff]  }
  0x51   : > { %3782 = vmatprep.subr.bf16.mxu1 %v4360_v29  ;;  %v410_v29 = vld [vmem:[%s4868_s23 + $0x2a] sm:$0xff]  ;;  %v4383_v48 = vld [vmem:[#allocation4 + $0x20] sm:$0xff]   ;;  %v4394_v60 = vld [vmem:[#allocation4 + $0xb8] sm:$0xff]  }
  0x52   : > { %v4381_v46 = vld [vmem:[#allocation4 + $0x90] sm:$0xff]   ;;  %v4387_v52 = vld [vmem:[#allocation4 + $0xa0] sm:$0xff]  }
  0x53   : > { %3743 = vmatpush3.bf16.msra.mxu0 %v4361_v30  ;;  %v411_v30 = vld [vmem:[%s4868_s23 + $0x32] sm:$0xff]  ;;  %s5091_s23 = scalar_lea.hbm %s5140_s7, %s3725_s14 }
  0x54   : > { %3783 = vmatpush3.bf16.msra.mxu1 %v4362_v31  ;;  %4088 = vmatprep.subr.bf16.mxu0 %v4363_v44  ;;  %v423_v31 = vpack.c.bf16 %v409_v28, %v408_v27  ;;  %v428_v32 = vpack.c.bf16 %v411_v30, %v410_v29  ;;  %v4388_v54 = vld [vmem:[#allocation4 + $0x70] sm:$0xff]  }
  0x55   : > { %3820 = vmatprep.subr.bf16.mxu1 %v4371_v36  ;;  %v4389_v55 = vld [vmem:[#allocation4 + $0x30] sm:$0xff]  }
  0x56   : > { %707 = vmatmul.mubr.bf16.vlgmr.msra.gmra.mrb[0].mxu0 %v414_v40  ;;  %v4375_v40 = vld [vmem:[#allocation4 + $0x80] sm:$0xff]   ;;  %v4393_v59 = vld [vmem:[#allocation4 + $0xb0] sm:$0xff]  }
  0x57   : > { %772 = vmatmul.mubr.bf16.vlgmr.msra.gmra.mrb[0].mxu1 %v416_v43  ;;  %4089 = vmatpush3.bf16.msra.mxu0 %v4363_v44  ;;  %v4378_v43 = vld [vmem:[#allocation4 + $0x88] sm:$0xff]   ;;  %v4379_v44 = vld [vmem:[#allocation4 + $0x58] sm:$0xff]  }
  0x58   : > { %4090 = vmatprep.subr.bf16.mxu0 %v4364_v45  ;;  %714 = vmatprep.mubr.bf16.mxu0 %v420_v50  ;;  %v4385_v50 = vld [vmem:[#allocation4 + $0x68] sm:$0xff]  }
  0x59   : > { %779 = vmatprep.mubr.bf16.mxu1 %v422_v51  ;;  %3821 = vmatpush3.bf16.msra.mxu1 %v4372_v37  ;;  %v4386_v51 = vld [vmem:[#allocation4 + $0x28] sm:$0xff]  }
  0x5a   : > { %3822 = vmatprep.subr.bf16.mxu1 %v4373_v38 }
  0x5b   : > { %4091 = vmatpush3.bf16.msra.mxu0 %v4364_v45  ;;  %v4380_v45 = vld [vmem:[#allocation4 + $0x18] sm:$0xff]  }
  0x5c   : > { %4092 = vmatprep.subr.bf16.mxu0 %v4365_v57 }
  0x5d   : > { %3823 = vmatpush3.bf16.msra.mxu1 %v4374_v39 }
  0x5e   : > { %715 = vmatmul.mubr.bf16.gmra.mrb[4].mxu0 %v419_v56  ;;  %3824 = vmatprep.subr.bf16.mxu1 %v4376_v41  ;;  %v4390_v56 = vld [vmem:[#allocation4 + $0xa8] sm:$0xff]  }
  0x5f   : > { %780 = vmatmul.mubr.bf16.gmra.mrb[4].mxu1 %v421_v58  ;;  %722 = vmatprep.mubr.bf16.mxu0 %v425_v61  ;;  %v4392_v58 = vld [vmem:[#allocation4 + $0x38] sm:$0xff]  }
  0x60   : > { %4093 = vmatpush3.bf16.msra.mxu0 %v4365_v57  ;;  %787 = vmatprep.mubr.bf16.mxu1 %v427_v1  ;;  %v4391_v57 = vld [vmem:[#allocation4 + $0x78] sm:$0xff]  }
  0x61   : > { %4094 = vmatprep.subr.bf16.mxu0 %v4366_v0  ;;  %3825 = vmatpush3.bf16.msra.mxu1 %v4377_v42 }
  0x62   : > { %3826 = vmatprep.subr.bf16.mxu1 %v4379_v44 }
  0x64   : > { %4095 = vmatpush3.bf16.msra.mxu0 %v4366_v0 }
  0x65   : > { %4096 = vmatprep.subr.bf16.mxu0 %v4367_v8  ;;  %3827 = vmatpush3.bf16.msra.mxu1 %v4380_v45 }
  0x66   : > { %723 = vmatmul.mubr.bf16.gmra.mrb[8].mxu0 %v424_v11  ;;  %3828 = vmatprep.subr.bf16.mxu1 %v4382_v47 }
  0x67   : > { %788 = vmatmul.mubr.bf16.gmra.mrb[8].mxu1 %v426_v12  ;;  %730 = vmatprep.mubr.bf16.mxu0 %v430_v13 }
  0x68   : > { %4097 = vmatpush3.bf16.msra.mxu0 %v4367_v8  ;;  %795 = vmatprep.mubr.bf16.mxu1 %v432_v14 }
  0x69   : > { %4098 = vmatprep.subr.bf16.mxu0 %v4368_v15  ;;  %3829 = vmatpush3.bf16.msra.mxu1 %v4383_v48 }
  0x6a   : > { %3830 = vmatprep.subr.bf16.mxu1 %v4385_v50 }
  0x6c   : > { %4099 = vmatpush3.bf16.msra.mxu0 %v4368_v15 }
  0x6d   : > { %4100 = vmatprep.subr.bf16.mxu0 %v4369_v21  ;;  %3831 = vmatpush3.bf16.msra.mxu1 %v4386_v51 }
  0x6e   : > { %731 = vmatmul.mubr.bf16.gmra.mrb[12].mxu0 %v429_v23  ;;  %3832 = vmatprep.subr.bf16.mxu1 %v4388_v54 }
  0x6f   : > { %796 = vmatmul.mubr.bf16.gmra.mrb[12].mxu1 %v431_v24  ;;  %4104 = vmatprep.mubr.bf16.mxu0 %v418_v26 }
  0x70   : > { %4101 = vmatpush3.bf16.msra.mxu0 %v4369_v21 }
  0x71   : > { %4102 = vmatprep.subr.bf16.mxu0 %v4370_v25  ;;  %3833 = vmatpush3.bf16.msra.mxu1 %v4389_v55  ;;  %v3533_v55 = vld [vmem:[%s5136_s3] ss:$0 sm:$0xff] }
  0x72   : > { %3834 = vmatprep.subr.bf16.mxu1 %v4391_v57 }
  0x74   : > { %4103 = vmatpush3.bf16.msra.mxu0 %v4370_v25 }
  0x75   : > { %4112 = vmatprep.subr.bf16.mxu0 %v4375_v40  ;;  %3835 = vmatpush3.bf16.msra.mxu1 %v4392_v58  ;;  %v3534_v58 = vld [vmem:[%s5137_s4] ss:$0 sm:$0xff] }
  0x77   : > { %4105 = vmatmul.mubr.bf16.vlgmr.msra.gmra.mrb[16].mxu0 %v423_v31 }
  0x78   : > { %4108 = vmatprep.mubr.bf16.mxu0 %v428_v32  ;;  %4113 = vmatpush3.bf16.msra.mxu0 %v4375_v40 }
  0x79   : > { %4114 = vmatprep.subr.bf16.mxu0 %v4378_v43 }
  0x7c   : > { %4115 = vmatpush3.bf16.msra.mxu0 %v4378_v43 }
  0x7d   : > { %4116 = vmatprep.subr.bf16.mxu0 %v4381_v46 }
  0x7f   : > { %4109 = vmatmul.mubr.bf16.gmra.mrb[20].mxu0 %v433_v35 }
  0x80   : > { %4117 = vmatpush3.bf16.msra.mxu0 %v4381_v46 }
  0x81   : > { %4118 = vmatprep.subr.bf16.mxu0 %v4384_v49 }
  0x84   : > { %4119 = vmatpush3.bf16.msra.mxu0 %v4384_v49 }
  0x85   : > { %4120 = vmatprep.subr.bf16.mxu0 %v4387_v52 }
  0x88   : > { %4121 = vmatpush3.bf16.msra.mxu0 %v4387_v52 }
  0x89   : > { %4122 = vmatprep.subr.bf16.mxu0 %v4390_v56 }
  0x8c   : > { %4123 = vmatpush3.bf16.msra.mxu0 %v4390_v56 }
  0x8d   : > { %4124 = vmatprep.subr.bf16.mxu0 %v4393_v59 }
  0x90   : > { %4125 = vmatpush3.bf16.msra.mxu0 %v4393_v59 }
  0x91   : > { %4126 = vmatprep.subr.bf16.mxu0 %v4394_v60 }
  0x94   : > { %4127 = vmatpush3.bf16.msra.mxu0 %v4394_v60 }
 0x129   : > { %v3744_v61 = vpop.f32.mrb[0].mxu0 }
 0x12a   : > { %v3784_v62 = vpop.f32.mrb[0].mxu1  ;;  %v3745_v63 = vpop.f32.mrb[1].mxu0 }
 0x12b   : > { %v3746_v0 = vadd.f32 %v3745_v63, %v3744_v61  ;;  %v3785_v1 = vpop.f32.mrb[1].mxu1  ;;  %v3747_v2 = vpop.f32.mrb[2].mxu0 }
 0x12c   : > { %v3786_v3 = vadd.f32 %v3785_v1, %v3784_v62  ;;  %v3787_v4 = vpop.f32.mrb[2].mxu1  ;;  %v3748_v5 = vpop.f32.mrb[3].mxu0 }
 0x12d   : > { %v3749_v6 = vadd.f32 %v3748_v5, %v3747_v2  ;;  %v3788_v7 = vpop.f32.mrb[3].mxu1 }
 0x12e   : > { %v3789_v8 = vadd.f32 %v3788_v7, %v3787_v4  ;;  %v774_v9 = vadd.f32 %v3786_v3, %v3746_v0 }
 0x130   : > { %v777_v10 = vadd.f32 %v3789_v8, %v3749_v6 }
 0x131   : > { %v3750_v11 = vpop.f32.mrb[4].mxu0 }
 0x132   : > { %v3790_v12 = vpop.f32.mrb[4].mxu1  ;;  %v3751_v13 = vpop.f32.mrb[5].mxu0 }
 0x133   : > { %v3752_v14 = vadd.f32 %v3751_v13, %v3750_v11  ;;  %v3791_v15 = vpop.f32.mrb[5].mxu1  ;;  %v3753_v16 = vpop.f32.mrb[6].mxu0 }
 0x134   : > { %v3792_v17 = vadd.f32 %v3791_v15, %v3790_v12  ;;  %v3793_v18 = vpop.f32.mrb[6].mxu1  ;;  %v3754_v19 = vpop.f32.mrb[7].mxu0 }
 0x135   : > { %v3755_v20 = vadd.f32 %v3754_v19, %v3753_v16  ;;  %v3794_v21 = vpop.f32.mrb[7].mxu1 }
 0x136   : > { %v3795_v22 = vadd.f32 %v3794_v21, %v3793_v18  ;;  %v782_v23 = vadd.f32 %v3792_v17, %v3752_v14 }
 0x138   : > { %v785_v24 = vadd.f32 %v3795_v22, %v3755_v20 }
 0x139   : > { %v3756_v25 = vpop.f32.mrb[8].mxu0 }
 0x13a   : > { %v3796_v26 = vpop.f32.mrb[8].mxu1  ;;  %v3757_v27 = vpop.f32.mrb[9].mxu0 }
 0x13b   : > { %v3758_v28 = vadd.f32 %v3757_v27, %v3756_v25  ;;  %v3797_v29 = vpop.f32.mrb[9].mxu1  ;;  %v3759_v30 = vpop.f32.mrb[10].mxu0 }
 0x13c   : > { %v3798_v31 = vadd.f32 %v3797_v29, %v3796_v26  ;;  %v3799_v32 = vpop.f32.mrb[10].mxu1  ;;  %v3760_v33 = vpop.f32.mrb[11].mxu0 }
 0x13d   : > { %v3761_v34 = vadd.f32 %v3760_v33, %v3759_v30  ;;  %v3800_v35 = vpop.f32.mrb[11].mxu1 }
 0x13e   : > { %v3801_v36 = vadd.f32 %v3800_v35, %v3799_v32  ;;  %v790_v37 = vadd.f32 %v3798_v31, %v3758_v28 }
 0x140   : > { %v793_v38 = vadd.f32 %v3801_v36, %v3761_v34 }
 0x141   : > { %v3762_v39 = vpop.f32.mrb[12].mxu0 }
 0x142   : > { %v3802_v40 = vpop.f32.mrb[12].mxu1  ;;  %v3763_v41 = vpop.f32.mrb[13].mxu0 }
 0x143   : > { %v3764_v42 = vadd.f32 %v3763_v41, %v3762_v39  ;;  %v3803_v43 = vpop.f32.mrb[13].mxu1  ;;  %v3765_v44 = vpop.f32.mrb[14].mxu0 }
 0x144   : > { %v3804_v45 = vadd.f32 %v3803_v43, %v3802_v40  ;;  %v3805_v46 = vpop.f32.mrb[14].mxu1  ;;  %v3766_v47 = vpop.f32.mrb[15].mxu0 }
 0x145   : > { %v3767_v48 = vadd.f32 %v3766_v47, %v3765_v44  ;;  %v3806_v49 = vpop.f32.mrb[15].mxu1 }
 0x146   : > { %v3807_v50 = vadd.f32 %v3806_v49, %v3805_v46  ;;  %v798_v51 = vadd.f32 %v3804_v45, %v3764_v42 }
 0x148   : > { %v801_v52 = vadd.f32 %v3807_v50, %v3767_v48 }
 0x14a   : > { %v4106_v54 = vpop.f32.mrb[16].mxu0 }
 0x14b   : > { %v847_v56 = vadd.f32 %v4106_v54, %v782_v23  ;;  %v838_v57 = vpop.f32.mrb[17].mxu0  ;;  %v4396_v54 = vld [vmem:[#allocation4 + $0xc0] sm:$0xff]  }
 0x14c   : > { %v839_v59 = vadd.f32 %v838_v57, %v774_v9  ;;  %v4107_v60 = vpop.f32.mrb[18].mxu0  ;;  %v4399_v57 = vld [vmem:[#allocation4 + $0x110] sm:$0xff]  }
 0x14d   : > { %v876_v61 = vmul.f32 %v3533_v55, %v847_v56  ;;  %v850_v62 = vadd.f32 %v4107_v60, %v785_v24  ;;  %v841_v63 = vpop.f32.mrb[19].mxu0  ;;  %v4398_v56 = vld [vmem:[#allocation4 + $0xc8] sm:$0xff]   ;;  %v4402_v60 = vld [vmem:[#allocation4 + $0xd8] sm:$0xff]  }
 0x14e   : > { %v874_v0 = vmul.f32 %v3533_v55, %v839_v59  ;;  %v842_v1 = vadd.f32 %v841_v63, %v777_v10  ;;  %v4401_v59 = vld [vmem:[#allocation4 + $0x118] sm:$0xff]   ;;  %v4405_v63 = vld [vmem:[#allocation4 + $0xe0] sm:$0xff]  }
 0x14f   : > { %v889_v2 = vadd.f32 %v3534_v58, %v876_v61  ;;  %v877_v3 = vmul.f32 %v3533_v55, %v850_v62  ;;  %v4403_v61 = vld [vmem:[#allocation4 + $0x140] sm:$0xff]  }
 0x150   : > { %v887_v4 = vadd.f32 %v3534_v58, %v874_v0  ;;  %v875_v5 = vmul.f32 %v3533_v55, %v842_v1  ;;  %v4404_v62 = vld [vmem:[#allocation4 + $0x120] sm:$0xff]   ;;  %4136 = vmatprep.subr.bf16.mxu0 %v4403_v61  ;;  %v4406_v0 = vld [vmem:[#allocation4 + $0x148] sm:$0xff]  }
 0x151   : > { %897 = vst [vmem:[#allocation2 + $0x18] sm:$0xff] %v889_v2  ;;  %v890_v6 = vadd.f32 %v3534_v58, %v877_v3  ;;  %v4407_v1 = vld [vmem:[#allocation4 + $0x128] sm:$0xff]   ;;  %v4409_v3 = vld [vmem:[#allocation4 + $0x150] sm:$0xff]  }
 0x152   : > { %895 = vst [vmem:[#allocation2 + $0x8] sm:$0xff] %v887_v4  ;;  %v888_v7 = vadd.f32 %v3534_v58, %v875_v5  ;;  %v4110_v8 = vpop.f32.mrb[20].mxu0  ;;  %v4411_v5 = vld [vmem:[#allocation4 + $0xf0] sm:$0xff]  }
 0x153   : > { %898 = vst [vmem:[#allocation2 + $0x20] sm:$0xff] %v890_v6  ;;  %v863_v11 = vadd.f32 %v4110_v8, %v798_v51  ;;  %v854_v12 = vpop.f32.mrb[21].mxu0  ;;  %v980_v13 = vpack.c.bf16 %v890_v6, %v889_v2  ;;  %v4408_v2 = vld [vmem:[#allocation4 + $0xe8] sm:$0xff]   ;;  %v4412_v6 = vld [vmem:[#allocation4 + $0x158] sm:$0xff]  }
 0x154   : > { %896 = vst [vmem:[#allocation2 + $0x10] sm:$0xff] %v888_v7  ;;  %v855_v9 = vadd.f32 %v854_v12, %v790_v37  ;;  %v4111_v14 = vpop.f32.mrb[22].mxu0  ;;  %v977_v15 = vpack.c.bf16 %v888_v7, %v887_v4  ;;  %v4410_v4 = vld [vmem:[#allocation4 + $0x130] sm:$0xff]   ;;  %v4413_v7 = vld [vmem:[#allocation4 + $0x138] sm:$0xff]   ;;  %v4416_v12 = vld [vmem:[#allocation4 + $0x168] sm:$0xff]  }
 0x155   : > { %v880_v16 = vmul.f32 %v3533_v55, %v863_v11  ;;  %v866_v17 = vadd.f32 %v4111_v14, %v801_v52  ;;  %v857_v10 = vpop.f32.mrb[23].mxu0  ;;  %v4395_v52 = vld [vmem:[#allocation4 + $0x100] sm:$0xff]   ;;  %v4414_v8 = vld [vmem:[#allocation4 + $0xf8] sm:$0xff]  }
 0x156   : > { %v878_v18 = vmul.f32 %v3533_v55, %v855_v9  ;;  %v858_v19 = vadd.f32 %v857_v10, %v793_v38  ;;  %1164 = vmatprep.mubr.bf16.mxu1 %v977_v15  ;;  %3872 = vmatprep.subr.bf16.mxu1 %v4395_v52  ;;  %v4415_v11 = vld [vmem:[#allocation4 + $0x160] sm:$0xff]   ;;  %v4418_v9 = vld [vmem:[#allocation4 + $0x178] sm:$0xff]  }
 0x157   : > { %v893_v20 = vadd.f32 %v3534_v58, %v880_v16  ;;  %v881_v21 = vmul.f32 %v3533_v55, %v866_v17 }
 0x158   : > { %v891_v22 = vadd.f32 %v3534_v58, %v878_v18  ;;  %v879_v23 = vmul.f32 %v3533_v55, %v858_v19  ;;  %v4397_v55 = vld [vmem:[#allocation4 + $0x108] sm:$0xff]  }
 0x159   : > { %901 = vst [vmem:[#allocation2 + $0x38] sm:$0xff] %v893_v20  ;;  %v894_v24 = vadd.f32 %v3534_v58, %v881_v21  ;;  %v952_v26 = vld [vmem:[#allocation2 + $0x7] sm:$0xff]  ;;  %v4954_v21 = vld [vmem:[%s5136_s3 + $0x1] ss:$0 sm:$0xff] }
 0x15a   : > { %899 = vst [vmem:[#allocation2 + $0x28] sm:$0xff] %v891_v22  ;;  %v892_v25 = vadd.f32 %v3534_v58, %v879_v23  ;;  %v970_v34 = vld [vmem:[#allocation2 + $0x19] sm:$0xff]  ;;  %v4400_v58 = vld [vmem:[#allocation4 + $0xd0] sm:$0xff]  }
 0x15b   : > { %902 = vst [vmem:[#allocation2 + $0x40] sm:$0xff] %v894_v24  ;;  %v968_v27 = vld [vmem:[#allocation2 + $0x9] sm:$0xff]  ;;  %v969_v28 = vld [vmem:[#allocation2 + $0x11] sm:$0xff]  ;;  %v986_v30 = vpack.c.bf16 %v894_v24, %v893_v20  ;;  %v955_v37 = vld [vmem:[#allocation2 + $0x1f] sm:$0xff] }
 0x15c   : > { %v953_v29 = vld [vmem:[#allocation2 + $0xf] sm:$0xff]  ;;  %900 = vst [vmem:[#allocation2 + $0x30] sm:$0xff] %v892_v25  ;;  %v978_v31 = vpack.c.bf16 %v969_v28, %v968_v27  ;;  %v983_v33 = vpack.c.bf16 %v892_v25, %v891_v22  ;;  %v954_v36 = vld [vmem:[#allocation2 + $0x17] sm:$0xff]  ;;  %v4959_v25 = vld [vmem:[%s5137_s4 + $0x1] ss:$0 sm:$0xff] }
 0x15d   : > { %v976_v32 = vpack.c.bf16 %v953_v29, %v952_v26  ;;  %v979_v44 = vpack.c.bf16 %v955_v37, %v954_v36 }
 0x15e   : > { %4128 = vmatprep.mubr.bf16.mxu0 %v978_v31 }
 0x15f   : > { %1165 = vmatmul.mubr.bf16.vlgmr.msra.gmra.mrb[16].mxu1 %v976_v32 }
 0x160   : > { %1172 = vmatprep.mubr.bf16.mxu1 %v980_v13  ;;  %3873 = vmatpush3.bf16.msra.mxu1 %v4396_v54  ;;  %v4417_v13 = vld [vmem:[#allocation4 + $0x170] sm:$0xff]  }
 0x161   : > { %v971_v35 = vld [vmem:[#allocation2 + $0x21] sm:$0xff]  ;;  %3874 = vmatprep.subr.bf16.mxu1 %v4397_v55 }
 0x162   : > { %v981_v38 = vpack.c.bf16 %v971_v35, %v970_v34  ;;  %v956_v39 = vld [vmem:[#allocation2 + $0x27] sm:$0xff]  ;;  %v974_v45 = vld [vmem:[#allocation2 + $0x39] sm:$0xff] }
 0x163   : > { %v972_v40 = vld [vmem:[#allocation2 + $0x29] sm:$0xff]  ;;  %v973_v41 = vld [vmem:[#allocation2 + $0x31] sm:$0xff]  ;;  %v975_v46 = vld [vmem:[#allocation2 + $0x41] sm:$0xff] }
 0x164   : > { %v957_v42 = vld [vmem:[#allocation2 + $0x2f] sm:$0xff]  ;;  %4129 = vmatmul.mubr.bf16.vlgmr.msra.gmra.mrb[24].mxu0 %v981_v38  ;;  %v984_v43 = vpack.c.bf16 %v973_v41, %v972_v40  ;;  %v987_v47 = vpack.c.bf16 %v975_v46, %v974_v45  ;;  %v958_v49 = vld [vmem:[#allocation2 + $0x37] sm:$0xff]  ;;  %v959_v50 = vld [vmem:[#allocation2 + $0x3f] sm:$0xff]  ;;  %3875 = vmatpush3.bf16.msra.mxu1 %v4398_v56 }
 0x165   : > { %1688 = vst [vmem:[#allocation2 + $0x28] sm:$0xff] %v4647_v53  ;;  %v982_v48 = vpack.c.bf16 %v957_v42, %v956_v39  ;;  %v985_v51 = vpack.c.bf16 %v959_v50, %v958_v49  ;;  %3876 = vmatprep.subr.bf16.mxu1 %v4399_v57  ;;  %4137 = vmatpush3.bf16.msra.mxu0 %v4403_v61 }
 0x166   : > { %4132 = vmatprep.mubr.bf16.mxu0 %v984_v43  ;;  %4138 = vmatprep.subr.bf16.mxu0 %v4406_v0 }
 0x167   : > { %1173 = vmatmul.mubr.bf16.gmra.mrb[20].mxu1 %v979_v44 }
 0x168   : > { %1180 = vmatprep.mubr.bf16.mxu1 %v983_v33  ;;  %3877 = vmatpush3.bf16.msra.mxu1 %v4400_v58 }
 0x169   : > { %3878 = vmatprep.subr.bf16.mxu1 %v4401_v59  ;;  %4139 = vmatpush3.bf16.msra.mxu0 %v4406_v0 }
 0x16a   : > { %4140 = vmatprep.subr.bf16.mxu0 %v4409_v3 }
 0x16c   : > { %4133 = vmatmul.mubr.bf16.gmra.mrb[28].mxu0 %v987_v47  ;;  %3879 = vmatpush3.bf16.msra.mxu1 %v4402_v60 }
 0x16d   : > { %3880 = vmatprep.subr.bf16.mxu1 %v4404_v62  ;;  %4141 = vmatpush3.bf16.msra.mxu0 %v4409_v3 }
 0x16e   : > { %4142 = vmatprep.subr.bf16.mxu0 %v4412_v6 }
 0x16f   : > { %1181 = vmatmul.mubr.bf16.gmra.mrb[24].mxu1 %v982_v48 }
 0x170   : > { %1188 = vmatprep.mubr.bf16.mxu1 %v986_v30  ;;  %3881 = vmatpush3.bf16.msra.mxu1 %v4405_v63 }
 0x171   : > { %3882 = vmatprep.subr.bf16.mxu1 %v4407_v1  ;;  %4143 = vmatpush3.bf16.msra.mxu0 %v4412_v6 }
 0x172   : > { %4144 = vmatprep.subr.bf16.mxu0 %v4415_v11 }
 0x174   : > { %3883 = vmatpush3.bf16.msra.mxu1 %v4408_v2 }
 0x175   : > { %3884 = vmatprep.subr.bf16.mxu1 %v4410_v4  ;;  %4145 = vmatpush3.bf16.msra.mxu0 %v4415_v11 }
 0x176   : > { %4146 = vmatprep.subr.bf16.mxu0 %v4416_v12 }
 0x177   : > { %1189 = vmatmul.mubr.bf16.gmra.mrb[28].mxu1 %v985_v51 }
 0x178   : > { %3885 = vmatpush3.bf16.msra.mxu1 %v4411_v5 }
 0x179   : > { %3886 = vmatprep.subr.bf16.mxu1 %v4413_v7  ;;  %4147 = vmatpush3.bf16.msra.mxu0 %v4416_v12 }
 0x17a   : > { %4148 = vmatprep.subr.bf16.mxu0 %v4417_v13 }
 0x17c   : > { %3887 = vmatpush3.bf16.msra.mxu1 %v4414_v8 }
 0x17d   : > { %4149 = vmatpush3.bf16.msra.mxu0 %v4417_v13 }
 0x17e   : > { %4150 = vmatprep.subr.bf16.mxu0 %v4418_v9 }
 0x181   : > { %4151 = vmatpush3.bf16.msra.mxu0 %v4418_v9 }
 0x232   : > { %v3836_v14 = vpop.f32.mrb[16].mxu1 }
 0x233   : > { %v3837_v15 = vpop.f32.mrb[17].mxu1 }
 0x234   : > { %v3838_v16 = vadd.f32 %v3837_v15, %v3836_v14  ;;  %v3839_v17 = vpop.f32.mrb[18].mxu1 }
 0x235   : > { %v3840_v10 = vpop.f32.mrb[19].mxu1 }
 0x236   : > { %v3841_v18 = vadd.f32 %v3840_v10, %v3839_v17 }
 0x237   : > { %v4130_v19 = vpop.f32.mrb[24].mxu0 }
 0x238   : > { %v1231_v20 = vpop.f32.mrb[25].mxu0 }
 0x239   : > { %v1232_v22 = vadd.f32 %v3838_v16, %v1231_v20  ;;  %v4131_v23 = vpop.f32.mrb[26].mxu0 }
 0x23a   : > { %v3842_v24 = vpop.f32.mrb[20].mxu1  ;;  %v1234_v26 = vpop.f32.mrb[27].mxu0 }
 0x23b   : > { %v3843_v27 = vpop.f32.mrb[21].mxu1  ;;  %v1267_v28 = vmul.f32 %v4954_v21, %v1232_v22  ;;  %v1235_v29 = vadd.f32 %v3841_v18, %v1234_v26 }
 0x23c   : > { %v3844_v30 = vadd.f32 %v3843_v27, %v3842_v24  ;;  %v3845_v31 = vpop.f32.mrb[22].mxu1 }
 0x23d   : > { %v3846_v32 = vpop.f32.mrb[23].mxu1  ;;  %v1280_v33 = vadd.f32 %v4959_v25, %v1267_v28  ;;  %v1268_v34 = vmul.f32 %v4954_v21, %v1235_v29 }
 0x23e   : > { %v1240_v35 = vadd.f32 %v4130_v19, %v3844_v30  ;;  %v3847_v36 = vadd.f32 %v3846_v32, %v3845_v31 }
 0x23f   : > { %v1288_v37 = vmax.f32 %v1280_v33, 0.0  ;;  %v1281_v38 = vadd.f32 %v4959_v25, %v1268_v34  ;;  %v4134_v41 = vpop.f32.mrb[28].mxu0 }
 0x240   : > { %v1269_v39 = vmul.f32 %v4954_v21, %v1240_v35  ;;  %v1243_v40 = vadd.f32 %v4131_v23, %v3847_v36  ;;  %v1247_v42 = vpop.f32.mrb[29].mxu0 }
 0x241   : > { %1296 = vst [vmem:[#allocation3 + $0x8] sm:$0xff] %v1288_v37  ;;  %v1289_v43 = vmax.f32 %v1281_v38, 0.0  ;;  %v4135_v46 = vpop.f32.mrb[30].mxu0 }
 0x242   : > { %v1282_v44 = vadd.f32 %v4959_v25, %v1269_v39  ;;  %v1270_v45 = vmul.f32 %v4954_v21, %v1243_v40  ;;  %v3848_v47 = vpop.f32.mrb[24].mxu1  ;;  %v1250_v48 = vpop.f32.mrb[31].mxu0 }
 0x243   : > { %v3849_v49 = vpop.f32.mrb[25].mxu1  ;;  %1297 = vst [vmem:[#allocation3 + $0x10] sm:$0xff] %v1289_v43 }
 0x244   : > { %v1290_v50 = vmax.f32 %v1282_v44, 0.0  ;;  %v1283_v51 = vadd.f32 %v4959_v25, %v1270_v45  ;;  %v3850_v52 = vadd.f32 %v3849_v49, %v3848_v47  ;;  %v3851_v54 = vpop.f32.mrb[26].mxu1 }
 0x245   : > { %v3852_v55 = vpop.f32.mrb[27].mxu1 }
 0x246   : > { %1298 = vst [vmem:[#allocation3 + $0x18] sm:$0xff] %v1290_v50  ;;  %v1291_v56 = vmax.f32 %v1283_v51, 0.0  ;;  %v1248_v57 = vadd.f32 %v3850_v52, %v1247_v42  ;;  %v3853_v58 = vadd.f32 %v3852_v55, %v3851_v54 }
 0x248   : > { %1299 = vst [vmem:[#allocation3 + $0x20] sm:$0xff] %v1291_v56  ;;  %v1271_v59 = vmul.f32 %v4954_v21, %v1248_v57  ;;  %v1251_v60 = vadd.f32 %v3853_v58, %v1250_v48 }
 0x24a   : > { %v1284_v61 = vadd.f32 %v4959_v25, %v1271_v59  ;;  %v1272_v62 = vmul.f32 %v4954_v21, %v1251_v60  ;;  %v3854_v63 = vpop.f32.mrb[28].mxu1  ;;  %v1375_v6 = vld [vmem:[#allocation3 + $0x8] ss:$2 sm:$0xff]  ;;  %v1383_v7 = vld [vmem:[#allocation3 + $0x9] ss:$2 sm:$0xff] }
 0x24b   : > { %v3855_v0 = vpop.f32.mrb[29].mxu1  ;;  %v1355_v13 = vld [vmem:[#allocation3 + $0x6] ss:$2 sm:$0xff]  ;;  %v1363_v9 = vld [vmem:[#allocation3 + $0x7] ss:$2 sm:$0xff]  ;;  %v1390_v18 = vmax.f32 %v1375_v6, %v1383_v7 }
 0x24c   : > { %v1292_v1 = vmax.f32 %v1284_v61, 0.0  ;;  %v1285_v2 = vadd.f32 %v4959_v25, %v1272_v62  ;;  %v3856_v3 = vadd.f32 %v3855_v0, %v3854_v63  ;;  %v3857_v4 = vpop.f32.mrb[30].mxu1  ;;  %v1370_v22 = vmax.f32 %v1355_v13, %v1363_v9  ;;  %v4419_v59 = vld [vmem:[#allocation4 + $0x1c0] sm:$0xff]   ;;  %v4422_v62 = vld [vmem:[#allocation4 + $0x1c8] sm:$0xff]   ;;  %v4430_v6 = vld [vmem:[#allocation4 + $0x218] sm:$0xff]  }
 0x24d   : > { %v3858_v5 = vpop.f32.mrb[31].mxu1  ;;  %v1395_v29 = vld [vmem:[#allocation3 + $0xa] ss:$2 sm:$0xff]  ;;  %v1403_v30 = vld [vmem:[#allocation3 + $0xb] ss:$2 sm:$0xff]  ;;  %3910 = vmatprep.subr.bf16.mxu1 %v4419_v59 }
 0x24e   : > { %1300 = vst [vmem:[#allocation3 + $0x28] sm:$0xff] %v1292_v1  ;;  %v1293_v8 = vmax.f32 %v1285_v2, 0.0  ;;  %v1256_v11 = vadd.f32 %v4134_v41, %v3856_v3  ;;  %v3859_v12 = vadd.f32 %v3858_v5, %v3857_v4  ;;  %v1410_v36 = vmax.f32 %v1395_v29, %v1403_v30  ;;  %v4420_v60 = vld [vmem:[#allocation4 + $0x180] sm:$0xff]   ;;  %v4424_v63 = vld [vmem:[#allocation4 + $0x208] sm:$0xff]   ;;  %v4425_v1 = vld [vmem:[#allocation4 + $0x1d0] sm:$0xff]  }
 0x24f   : > { %v1377_v14 = vld [vmem:[#allocation3 + $0x18] ss:$2 sm:$0xff]  ;;  %v1385_v15 = vld [vmem:[#allocation3 + $0x19] ss:$2 sm:$0xff]  ;;  %v4421_v61 = vld [vmem:[#allocation4 + $0x200] sm:$0xff]  }
 0x250   : > { %v1357_v16 = vld [vmem:[#allocation3 + $0x16] ss:$2 sm:$0xff]  ;;  %1301 = vst [vmem:[#allocation3 + $0x30] sm:$0xff] %v1293_v8  ;;  %v1273_v17 = vmul.f32 %v4954_v21, %v1256_v11  ;;  %v1259_v10 = vadd.f32 %v4135_v46, %v3859_v12  ;;  %v1391_v19 = vmax.f32 %v1377_v14, %v1385_v15  ;;  %v1365_v20 = vld [vmem:[#allocation3 + $0x17] ss:$2 sm:$0xff]  ;;  %4156 = vmatprep.subr.bf16.mxu0 %v4421_v61  ;;  %v4428_v4 = vld [vmem:[#allocation4 + $0x1d8] sm:$0xff]  }
 0x251   : > { %v1371_v23 = vmax.f32 %v1357_v16, %v1365_v20  ;;  %v4423_v0 = vld [vmem:[#allocation4 + $0x188] sm:$0xff]   ;;  %v4426_v2 = vld [vmem:[#allocation4 + $0x190] sm:$0xff]   ;;  %v4429_v5 = vld [vmem:[#allocation4 + $0x198] sm:$0xff]  }
 0x252   : > { %v1286_v24 = vadd.f32 %v4959_v25, %v1273_v17  ;;  %v1274_v26 = vmul.f32 %v4954_v21, %v1259_v10  ;;  %v1415_v27 = vpack.c.bf16 %v1391_v19, %v1390_v18  ;;  %v4427_v3 = vld [vmem:[#allocation4 + $0x210] sm:$0xff]   ;;  %v4431_v7 = vld [vmem:[#allocation4 + $0x1e0] sm:$0xff]   ;;  %v4434_v12 = vld [vmem:[#allocation4 + $0x1e8] sm:$0xff]  }
 0x253   : > { %v1414_v28 = vpack.c.bf16 %v1371_v23, %v1370_v22  ;;  %v4432_v8 = vld [vmem:[#allocation4 + $0x1a0] sm:$0xff]   ;;  %v4435_v13 = vld [vmem:[#allocation4 + $0x1a8] sm:$0xff]   ;;  %v4437_v14 = vld [vmem:[#allocation4 + $0x1f0] sm:$0xff]  }
 0x254   : > { %v1294_v31 = vmax.f32 %v1286_v24, 0.0  ;;  %v1287_v32 = vadd.f32 %v4959_v25, %v1274_v26  ;;  %1596 = vmatprep.mubr.bf16.mxu1 %v1415_v27  ;;  %v4433_v11 = vld [vmem:[#allocation4 + $0x220] sm:$0xff]   ;;  %v4436_v9 = vld [vmem:[#allocation4 + $0x228] sm:$0xff]   ;;  %v4438_v15 = vld [vmem:[#allocation4 + $0x1b0] sm:$0xff]  }
 0x255   : > { %1597 = vmatmul.mubr.bf16.vlgmr.msra.gmra.mrb[32].mxu1 %v1414_v28  ;;  %v1397_v33 = vld [vmem:[#allocation3 + $0x1a] ss:$2 sm:$0xff]  ;;  %v1405_v34 = vld [vmem:[#allocation3 + $0x1b] ss:$2 sm:$0xff]  ;;  %v4443_v19 = vld [vmem:[#allocation4 + $0x280] sm:$0xff]  }
 0x256   : > { %1302 = vst [vmem:[#allocation3 + $0x38] sm:$0xff] %v1294_v31  ;;  %v1295_v35 = vmax.f32 %v1287_v32, 0.0  ;;  %v1411_v37 = vmax.f32 %v1397_v33, %v1405_v34  ;;  %3911 = vmatpush3.bf16.msra.mxu1 %v4420_v60  ;;  %v4439_v16 = vld [vmem:[#allocation4 + $0x230] sm:$0xff]   ;;  %v4440_v17 = vld [vmem:[#allocation4 + $0x1f8] sm:$0xff]   ;;  %v3585_v31 = vld [vmem:[%s5136_s3 + $0x2] ss:$0 sm:$0xff] }
 0x257   : > { %v1379_v39 = vld [vmem:[#allocation3 + $0x28] ss:$2 sm:$0xff]  ;;  %v1387_v21 = vld [vmem:[#allocation3 + $0x29] ss:$2 sm:$0xff]  ;;  %3912 = vmatprep.subr.bf16.mxu1 %v4422_v62 }
 0x258   : > { %1303 = vst [vmem:[#allocation3 + $0x40] sm:$0xff] %v1295_v35  ;;  %v1416_v38 = vpack.c.bf16 %v1411_v37, %v1410_v36  ;;  %v1359_v40 = vld [vmem:[#allocation3 + $0x26] ss:$2 sm:$0xff]  ;;  %v1367_v43 = vld [vmem:[#allocation3 + $0x27] ss:$2 sm:$0xff]  ;;  %v1392_v46 = vmax.f32 %v1379_v39, %v1387_v21 }
 0x259   : > { %v1372_v54 = vmax.f32 %v1359_v40, %v1367_v43  ;;  %v4441_v10 = vld [vmem:[#allocation4 + $0x1b8] sm:$0xff]   ;;  %v3586_v37 = vld [vmem:[%s5137_s4 + $0x2] ss:$0 sm:$0xff] }
 0x25a   : > { %4152 = vmatprep.mubr.bf16.mxu0 %v1416_v38  ;;  %3913 = vmatpush3.bf16.msra.mxu1 %v4423_v0  ;;  %v4442_v18 = vld [vmem:[#allocation4 + $0x238] sm:$0xff]   ;;  %v4445_v0 = vld [vmem:[#allocation4 + $0x288] sm:$0xff]  }
 0x25b   : > { %3914 = vmatprep.subr.bf16.mxu1 %v4425_v1 }
 0x25d   : > { %v1399_v41 = vld [vmem:[#allocation3 + $0x2a] ss:$2 sm:$0xff]  ;;  %v1407_v42 = vld [vmem:[#allocation3 + $0x2b] ss:$2 sm:$0xff] }
 0x25e   : > { %2024 = vst [vmem:[#allocation3 + $0x28] sm:$0xff] %v4647_v53  ;;  %v1412_v51 = vmax.f32 %v1399_v41, %v1407_v42  ;;  %3915 = vmatpush3.bf16.msra.mxu1 %v4426_v2 }
 0x25f   : > { %v1381_v25 = vld [vmem:[#allocation3 + $0x38] ss:$2 sm:$0xff]  ;;  %v1389_v44 = vld [vmem:[#allocation3 + $0x39] ss:$2 sm:$0xff]  ;;  %3916 = vmatprep.subr.bf16.mxu1 %v4428_v4 }
 0x260   : > { %v1401_v45 = vld [vmem:[#allocation3 + $0x3a] ss:$2 sm:$0xff]  ;;  %v1393_v47 = vmax.f32 %v1381_v25, %v1389_v44  ;;  %v1409_v48 = vld [vmem:[#allocation3 + $0x3b] ss:$2 sm:$0xff] }
 0x261   : > { %v1361_v49 = vld [vmem:[#allocation3 + $0x36] ss:$2 sm:$0xff]  ;;  %v1369_v50 = vld [vmem:[#allocation3 + $0x37] ss:$2 sm:$0xff]  ;;  %v1413_v52 = vmax.f32 %v1401_v45, %v1409_v48 }
 0x262   : > { %v1373_v55 = vmax.f32 %v1361_v49, %v1369_v50  ;;  %v1418_v56 = vpack.c.bf16 %v1393_v47, %v1392_v46  ;;  %3917 = vmatpush3.bf16.msra.mxu1 %v4429_v5  ;;  %v4446_v4 = vld [vmem:[#allocation4 + $0x248] sm:$0xff]  }
 0x263   : > { %v1419_v57 = vpack.c.bf16 %v1413_v52, %v1412_v51  ;;  %3918 = vmatprep.subr.bf16.mxu1 %v4431_v7 }
 0x264   : > { %v1417_v58 = vpack.c.bf16 %v1373_v55, %v1372_v54  ;;  %1604 = vmatprep.mubr.bf16.mxu1 %v1418_v56 }
 0x265   : > { %4153 = vmatmul.mubr.bf16.vlgmr.msra.gmra.mrb[32].mxu0 %v1419_v57 }
 0x266   : > { %1605 = vmatmul.mubr.bf16.gmra.mrb[36].mxu1 %v1417_v58  ;;  %4157 = vmatpush3.bf16.msra.mxu0 %v4421_v61  ;;  %v4444_v58 = vld [vmem:[#allocation4 + $0x240] sm:$0xff]  }
 0x267   : > { %4158 = vmatprep.subr.bf16.mxu0 %v4424_v63  ;;  %3919 = vmatpush3.bf16.msra.mxu1 %v4432_v8  ;;  %v4447_v8 = vld [vmem:[#allocation4 + $0x2c0] sm:$0xff]  }
 0x268   : > { %3920 = vmatprep.subr.bf16.mxu1 %v4434_v12  ;;  %v4449_v12 = vld [vmem:[#allocation4 + $0x250] sm:$0xff]  }
 0x26a   : > { %4159 = vmatpush3.bf16.msra.mxu0 %v4424_v63 }
 0x26b   : > { %4160 = vmatprep.subr.bf16.mxu0 %v4427_v3  ;;  %3921 = vmatpush3.bf16.msra.mxu1 %v4435_v13  ;;  %v4450_v13 = vld [vmem:[#allocation4 + $0x2c8] sm:$0xff]  }
 0x26c   : > { %3922 = vmatprep.subr.bf16.mxu1 %v4437_v14  ;;  %v4453_v14 = vld [vmem:[#allocation4 + $0x2d0] sm:$0xff]  }
 0x26e   : > { %4161 = vmatpush3.bf16.msra.mxu0 %v4427_v3 }
 0x26f   : > { %4162 = vmatprep.subr.bf16.mxu0 %v4430_v6  ;;  %3923 = vmatpush3.bf16.msra.mxu1 %v4438_v15  ;;  %v4454_v15 = vld [vmem:[#allocation4 + $0x2a0] sm:$0xff]  }
 0x270   : > { %3924 = vmatprep.subr.bf16.mxu1 %v4440_v17  ;;  %v4456_v17 = vld [vmem:[#allocation4 + $0x2d8] sm:$0xff]  }
 0x272   : > { %4163 = vmatpush3.bf16.msra.mxu0 %v4430_v6 }
 0x273   : > { %4164 = vmatprep.subr.bf16.mxu0 %v4433_v11  ;;  %3925 = vmatpush3.bf16.msra.mxu1 %v4441_v10  ;;  %v4457_v10 = vld [vmem:[#allocation4 + $0x2a8] sm:$0xff]  }
 0x274   : > { %3948 = vmatprep.subr.bf16.mxu1 %v4443_v19  ;;  %v4459_v19 = vld [vmem:[#allocation4 + $0x2e0] sm:$0xff]  }
 0x276   : > { %4165 = vmatpush3.bf16.msra.mxu0 %v4433_v11  ;;  %v4448_v11 = vld [vmem:[#allocation4 + $0x290] sm:$0xff]  }
 0x277   : > { %4166 = vmatprep.subr.bf16.mxu0 %v4436_v9 }
 0x27a   : > { %4167 = vmatpush3.bf16.msra.mxu0 %v4436_v9  ;;  %v4451_v9 = vld [vmem:[#allocation4 + $0x298] sm:$0xff]  }
 0x27b   : > { %4168 = vmatprep.subr.bf16.mxu0 %v4439_v16 }
 0x27e   : > { %4169 = vmatpush3.bf16.msra.mxu0 %v4439_v16  ;;  %v4455_v16 = vld [vmem:[#allocation4 + $0x260] sm:$0xff]  }
 0x27f   : > { %4170 = vmatprep.subr.bf16.mxu0 %v4442_v18 }
 0x282   : > { %4171 = vmatpush3.bf16.msra.mxu0 %v4442_v18  ;;  %v4458_v18 = vld [vmem:[#allocation4 + $0x268] sm:$0xff]  }
 0x283   : > { %4176 = vmatprep.subr.bf16.mxu0 %v4447_v8 }
 0x328   : > { %v3888_v20 = vpop.f32.mrb[32].mxu1 }
 0x329   : > { %v3889_v22 = vpop.f32.mrb[33].mxu1 }
 0x32a   : > { %v3890_v23 = vadd.f32 %v3889_v22, %v3888_v20  ;;  %v3891_v24 = vpop.f32.mrb[34].mxu1  ;;  %v4460_v20 = vld [vmem:[#allocation4 + $0x2b0] sm:$0xff]  }
 0x32b   : > { %v3892_v26 = vpop.f32.mrb[35].mxu1  ;;  %v4461_v22 = vld [vmem:[#allocation4 + $0x270] sm:$0xff]  }
 0x32c   : > { %v3893_v27 = vadd.f32 %v3892_v26, %v3891_v24  ;;  %v4463_v24 = vld [vmem:[#allocation4 + $0x2b8] sm:$0xff]  }
 0x32d   : > { %v4464_v26 = vld [vmem:[#allocation4 + $0x278] sm:$0xff]  }
 0x338   : > { %v4154_v28 = vpop.f32.mrb[32].mxu0 }
 0x339   : > { %v3894_v29 = vpop.f32.mrb[36].mxu1  ;;  %v1647_v30 = vpop.f32.mrb[33].mxu0 }
 0x33a   : > { %v3895_v32 = vpop.f32.mrb[37].mxu1  ;;  %v1648_v33 = vadd.f32 %v3890_v23, %v1647_v30  ;;  %v4155_v35 = vpop.f32.mrb[34].mxu0  ;;  %v4462_v23 = vld [vmem:[#allocation4 + $0x2e8] sm:$0xff]  }
 0x33b   : > { %v3896_v34 = vadd.f32 %v3895_v32, %v3894_v29  ;;  %v3897_v36 = vpop.f32.mrb[38].mxu1  ;;  %v1650_v38 = vpop.f32.mrb[35].mxu0  ;;  %v4985_v29 = vld [vmem:[#allocation2] sm:$0xff] }
 0x33c   : > { %v3898_v39 = vpop.f32.mrb[39].mxu1  ;;  %v1667_v21 = vmul.f32 %v3585_v31, %v1648_v33  ;;  %v1651_v41 = vadd.f32 %v3893_v27, %v1650_v38  ;;  %v4465_v27 = vld [vmem:[#allocation4 + $0x2f0] sm:$0xff]  }
 0x33d   : > { %v1656_v40 = vadd.f32 %v4154_v28, %v3896_v34  ;;  %v3899_v42 = vadd.f32 %v3898_v39, %v3897_v36  ;;  %v4466_v28 = vld [vmem:[#allocation4 + $0x2f8] sm:$0xff]  }
 0x33e   : > { %v1676_v43 = vadd.f32 %v3586_v37, %v1667_v21  ;;  %v1668_v44 = vmul.f32 %v3585_v31, %v1651_v41 }
 0x33f   : > { %v1669_v25 = vmul.f32 %v3585_v31, %v1656_v40  ;;  %v1659_v45 = vadd.f32 %v4155_v35, %v3899_v42  ;;  %v3612_v40 = vld [vmem:[%s5137_s4 + $0x3] ss:$0 sm:$0xff] }
 0x340   : > { %v1680_v46 = vmax.f32 %v1676_v43, 0.0  ;;  %v1677_v48 = vadd.f32 %v3586_v37, %v1668_v44 }
 0x341   : > { %v1678_v47 = vadd.f32 %v3586_v37, %v1669_v25  ;;  %v1670_v49 = vmul.f32 %v3585_v31, %v1659_v45 }
 0x342   : > { %1684 = vst [vmem:[#allocation2 + $0x8] sm:$0xff] %v1680_v46  ;;  %v1681_v51 = vmax.f32 %v1677_v48, 0.0 }
 0x343   : > { %v1682_v50 = vmax.f32 %v1678_v47, 0.0  ;;  %v1679_v52 = vadd.f32 %v3586_v37, %v1670_v49  ;;  %v3611_v37 = vld [vmem:[%s5136_s3 + $0x3] ss:$0 sm:$0xff] }
 0x344   : > { %1685 = vst [vmem:[#allocation2 + $0x10] sm:$0xff] %v1681_v51  ;;  %v1751_v55 = vpack.c.bf16 %v1681_v51, %v1680_v46 }
 0x345   : > { %1686 = vst [vmem:[#allocation2 + $0x18] sm:$0xff] %v1682_v50  ;;  %v1683_v54 = vmax.f32 %v1679_v52, 0.0 }
 0x346   : > { %1932 = vmatprep.mubr.bf16.mxu1 %v1751_v55 }
 0x347   : > { %1687 = vst [vmem:[#allocation2 + $0x20] sm:$0xff] %v1683_v54  ;;  %v1754_v56 = vpack.c.bf16 %v1683_v54, %v1682_v50 }
 0x349   : > { %v1738_v57 = vld [vmem:[#allocation2 + $0x7] sm:$0xff] }
 0x34b   : > { %v1739_v59 = vld [vmem:[#allocation2 + $0xf] sm:$0xff] }
 0x34c   : > { %v1746_v60 = vld [vmem:[#allocation2 + $0x9] sm:$0xff]  ;;  %v1747_v61 = vld [vmem:[#allocation2 + $0x11] sm:$0xff]  ;;  %v1750_v62 = vpack.c.bf16 %v1739_v59, %v1738_v57 }
 0x34d   : > { %v1752_v63 = vpack.c.bf16 %v1747_v61, %v1746_v60  ;;  %v1740_v6 = vld [vmem:[#allocation2 + $0x17] sm:$0xff] }
 0x34e   : > { %v1748_v1 = vld [vmem:[#allocation2 + $0x19] sm:$0xff]  ;;  %v1749_v2 = vld [vmem:[#allocation2 + $0x21] sm:$0xff]  ;;  %1933 = vmatmul.mubr.bf16.vlgmr.msra.gmra.mrb[40].mxu1 %v1750_v62 }
 0x34f   : > { %4172 = vmatprep.mubr.bf16.mxu0 %v1752_v63  ;;  %v1755_v3 = vpack.c.bf16 %v1749_v2, %v1748_v1  ;;  %2360 = vst [vmem:[#allocation2 + $0x28] sm:$0xff] %v4647_v53  ;;  %1940 = vmatprep.mubr.bf16.mxu1 %v1754_v56  ;;  %v1741_v5 = vld [vmem:[#allocation2 + $0x1f] sm:$0xff] }
 0x350   : > { %3949 = vmatpush3.bf16.msra.mxu1 %v4444_v58  ;;  %v1753_v7 = vpack.c.bf16 %v1741_v5, %v1740_v6  ;;  %v4452_v53 = vld [vmem:[#allocation4 + $0x258] sm:$0xff]  }
 0x351   : > { %4173 = vmatmul.mubr.bf16.vlgmr.msra.gmra.mrb[36].mxu0 %v1755_v3  ;;  %3950 = vmatprep.subr.bf16.mxu1 %v4445_v0 }
 0x352   : > { %4177 = vmatpush3.bf16.msra.mxu0 %v4447_v8 }
 0x353   : > { %4178 = vmatprep.subr.bf16.mxu0 %v4450_v13 }
 0x354   : > { %3951 = vmatpush3.bf16.msra.mxu1 %v4446_v4 }
 0x355   : > { %3952 = vmatprep.subr.bf16.mxu1 %v4448_v11 }
 0x356   : > { %1941 = vmatmul.mubr.bf16.gmra.mrb[44].mxu1 %v1753_v7  ;;  %4179 = vmatpush3.bf16.msra.mxu0 %v4450_v13 }
 0x357   : > { %4180 = vmatprep.subr.bf16.mxu0 %v4453_v14 }
 0x358   : > { %3953 = vmatpush3.bf16.msra.mxu1 %v4449_v12 }
 0x359   : > { %3954 = vmatprep.subr.bf16.mxu1 %v4451_v9 }
 0x35a   : > { %4181 = vmatpush3.bf16.msra.mxu0 %v4453_v14  ;;  %v4468_v14 = vld [vmem:[#allocation4 + $0x380] sm:$0xff]  }
 0x35b   : > { %4182 = vmatprep.subr.bf16.mxu0 %v4456_v17 }
 0x35c   : > { %3955 = vmatpush3.bf16.msra.mxu1 %v4452_v53  ;;  %v4467_v53 = vld [vmem:[#allocation4 + $0x340] sm:$0xff]  }
 0x35d   : > { %3956 = vmatprep.subr.bf16.mxu1 %v4454_v15  ;;  %v4469_v15 = vld [vmem:[#allocation4 + $0x300] sm:$0xff]  }
 0x35e   : > { %4183 = vmatpush3.bf16.msra.mxu0 %v4456_v17  ;;  %v4471_v17 = vld [vmem:[#allocation4 + $0x388] sm:$0xff]  }
 0x35f   : > { %4184 = vmatprep.subr.bf16.mxu0 %v4459_v19 }
 0x360   : > { %3957 = vmatpush3.bf16.msra.mxu1 %v4455_v16  ;;  %v4470_v16 = vld [vmem:[#allocation4 + $0x348] sm:$0xff]  }
 0x361   : > { %3958 = vmatprep.subr.bf16.mxu1 %v4457_v10  ;;  %v4472_v10 = vld [vmem:[#allocation4 + $0x308] sm:$0xff]  }
 0x362   : > { %4185 = vmatpush3.bf16.msra.mxu0 %v4459_v19  ;;  %v4474_v19 = vld [vmem:[#allocation4 + $0x390] sm:$0xff]  }
 0x363   : > { %4186 = vmatprep.subr.bf16.mxu0 %v4462_v23 }
 0x364   : > { %3959 = vmatpush3.bf16.msra.mxu1 %v4458_v18  ;;  %v4473_v18 = vld [vmem:[#allocation4 + $0x350] sm:$0xff]  }
 0x365   : > { %3960 = vmatprep.subr.bf16.mxu1 %v4460_v20  ;;  %v4475_v20 = vld [vmem:[#allocation4 + $0x310] sm:$0xff]  }
 0x366   : > { %4187 = vmatpush3.bf16.msra.mxu0 %v4462_v23  ;;  %v4477_v23 = vld [vmem:[#allocation4 + $0x398] sm:$0xff]  }
 0x367   : > { %4188 = vmatprep.subr.bf16.mxu0 %v4465_v27 }
 0x368   : > { %3961 = vmatpush3.bf16.msra.mxu1 %v4461_v22  ;;  %v4476_v22 = vld [vmem:[#allocation4 + $0x358] sm:$0xff]  }
 0x369   : > { %3962 = vmatprep.subr.bf16.mxu1 %v4463_v24  ;;  %v4478_v24 = vld [vmem:[#allocation4 + $0x318] sm:$0xff]  }
 0x36a   : > { %4189 = vmatpush3.bf16.msra.mxu0 %v4465_v27  ;;  %v4480_v27 = vld [vmem:[#allocation4 + $0x3a0] sm:$0xff]  }
 0x36b   : > { %4190 = vmatprep.subr.bf16.mxu0 %v4466_v28 }
 0x36c   : > { %3963 = vmatpush3.bf16.msra.mxu1 %v4464_v26  ;;  %v4479_v26 = vld [vmem:[#allocation4 + $0x360] sm:$0xff]  }
 0x36d   : > { %3986 = vmatprep.subr.bf16.mxu1 %v4467_v53 }
 0x36e   : > { %4191 = vmatpush3.bf16.msra.mxu0 %v4466_v28  ;;  %v4481_v28 = vld [vmem:[#allocation4 + $0x320] sm:$0xff]  }
 0x36f   : > { %4196 = vmatprep.subr.bf16.mxu0 %v4985_v29 }
 0x421   : > { %v3926_v30 = vpop.f32.mrb[40].mxu1 }
 0x422   : > { %v3927_v31 = vpop.f32.mrb[41].mxu1 }
 0x423   : > { %v3928_v32 = vadd.f32 %v3927_v31, %v3926_v30  ;;  %v3929_v33 = vpop.f32.mrb[42].mxu1  ;;  %v4482_v30 = vld [vmem:[#allocation4 + $0x368] sm:$0xff]  }
 0x424   : > { %v4174_v34 = vpop.f32.mrb[36].mxu0  ;;  %v3930_v35 = vpop.f32.mrb[43].mxu1  ;;  %v4483_v31 = vld [vmem:[#allocation4 + $0x3a8] sm:$0xff]  }
 0x425   : > { %v1983_v36 = vpop.f32.mrb[37].mxu0  ;;  %v3931_v38 = vadd.f32 %v3930_v35, %v3929_v33  ;;  %v4485_v33 = vld [vmem:[#allocation4 + $0x370] sm:$0xff]  }
 0x426   : > { %v1984_v39 = vadd.f32 %v3928_v32, %v1983_v36  ;;  %v4175_v21 = vpop.f32.mrb[38].mxu0  ;;  %v4484_v32 = vld [vmem:[#allocation4 + $0x328] sm:$0xff]   ;;  %v4487_v35 = vld [vmem:[#allocation4 + $0x330] sm:$0xff]   ;;  %v4488_v36 = vld [vmem:[#allocation4 + $0x378] sm:$0xff]  }
 0x427   : > { %v1986_v41 = vpop.f32.mrb[39].mxu0 }
 0x428   : > { %v2003_v42 = vmul.f32 %v3611_v37, %v1984_v39  ;;  %v1987_v43 = vadd.f32 %v3931_v38, %v1986_v41  ;;  %v4490_v38 = vld [vmem:[#allocation4 + $0x338] sm:$0xff]   ;;  %v4491_v39 = vld [vmem:[#allocation4 + $0x400] sm:$0xff]  }
 0x429   : > { %v3932_v45 = vpop.f32.mrb[44].mxu1 }
 0x42a   : > { %v2012_v25 = vadd.f32 %v3612_v40, %v2003_v42  ;;  %v2004_v44 = vmul.f32 %v3611_v37, %v1987_v43  ;;  %v3933_v46 = vpop.f32.mrb[45].mxu1 }
 0x42b   : > { %v3934_v49 = vadd.f32 %v3933_v46, %v3932_v45  ;;  %v3935_v50 = vpop.f32.mrb[46].mxu1 }
 0x42c   : > { %v2016_v47 = vmax.f32 %v2012_v25, 0.0  ;;  %v2013_v48 = vadd.f32 %v3612_v40, %v2004_v44  ;;  %v3936_v51 = vpop.f32.mrb[47].mxu1 }
 0x42d   : > { %v1992_v54 = vadd.f32 %v4174_v34, %v3934_v49  ;;  %v3937_v55 = vadd.f32 %v3936_v51, %v3935_v50  ;;  %v4486_v34 = vld [vmem:[#allocation4 + $0x3b0] sm:$0xff]  }
 0x42e   : > { %2020 = vst [vmem:[#allocation3 + $0x8] sm:$0xff] %v2016_v47  ;;  %v2017_v52 = vmax.f32 %v2013_v48, 0.0 }
 0x42f   : > { %v2005_v56 = vmul.f32 %v3611_v37, %v1992_v54  ;;  %v1995_v57 = vadd.f32 %v4175_v21, %v3937_v55  ;;  %v3638_v54 = vld [vmem:[%s5137_s4 + $0x4] ss:$0 sm:$0xff] }
 0x430   : > { %2021 = vst [vmem:[#allocation3 + $0x10] sm:$0xff] %v2017_v52  ;;  %v2087_v58 = vpack.c.bf16 %v2017_v52, %v2016_v47  ;;  %v3637_v47 = vld [vmem:[%s5136_s3 + $0x4] ss:$0 sm:$0xff] }
 0x431   : > { %v2014_v59 = vadd.f32 %v3612_v40, %v2005_v56  ;;  %v2006_v60 = vmul.f32 %v3611_v37, %v1995_v57  ;;  %v4489_v37 = vld [vmem:[#allocation4 + $0x3b8] sm:$0xff]  }
 0x432   : > { %2268 = vmatprep.mubr.bf16.mxu1 %v2087_v58 }
 0x433   : > { %v2018_v61 = vmax.f32 %v2014_v59, 0.0  ;;  %v2015_v62 = vadd.f32 %v3612_v40, %v2006_v60 }
 0x435   : > { %2022 = vst [vmem:[#allocation3 + $0x18] sm:$0xff] %v2018_v61  ;;  %v2019_v63 = vmax.f32 %v2015_v62, 0.0  ;;  %v2074_v0 = vld [vmem:[#allocation3 + $0x7] sm:$0xff] }
 0x437   : > { %v2075_v1 = vld [vmem:[#allocation3 + $0xf] sm:$0xff]  ;;  %2023 = vst [vmem:[#allocation3 + $0x20] sm:$0xff] %v2019_v63  ;;  %v2090_v3 = vpack.c.bf16 %v2019_v63, %v2018_v61 }
 0x438   : > { %v2086_v2 = vpack.c.bf16 %v2075_v1, %v2074_v0  ;;  %v2082_v4 = vld [vmem:[#allocation3 + $0x9] sm:$0xff] }
 0x43a   : > { %2269 = vmatmul.mubr.bf16.vlgmr.msra.gmra.mrb[48].mxu1 %v2086_v2 }
 0x43b   : > { %2276 = vmatprep.mubr.bf16.mxu1 %v2090_v3  ;;  %3987 = vmatpush3.bf16.msra.mxu1 %v4469_v15 }
 0x43c   : > { %v2083_v5 = vld [vmem:[#allocation3 + $0x11] sm:$0xff]  ;;  %3988 = vmatprep.subr.bf16.mxu1 %v4470_v16 }
 0x43d   : > { %v2088_v6 = vpack.c.bf16 %v2083_v5, %v2082_v4  ;;  %v2076_v7 = vld [vmem:[#allocation3 + $0x17] sm:$0xff] }
 0x43e   : > { %v2084_v8 = vld [vmem:[#allocation3 + $0x19] sm:$0xff]  ;;  %v2085_v11 = vld [vmem:[#allocation3 + $0x21] sm:$0xff] }
 0x43f   : > { %v2077_v12 = vld [vmem:[#allocation3 + $0x1f] sm:$0xff]  ;;  %4192 = vmatprep.mubr.bf16.mxu0 %v2088_v6  ;;  %v2091_v13 = vpack.c.bf16 %v2085_v11, %v2084_v8  ;;  %3989 = vmatpush3.bf16.msra.mxu1 %v4472_v10 }
 0x440   : > { %v2089_v9 = vpack.c.bf16 %v2077_v12, %v2076_v7  ;;  %2687 = vst [vmem:[#allocation3 + $0x18] sm:$0xff] %v4985_v29  ;;  %3990 = vmatprep.subr.bf16.mxu1 %v4473_v18 }
 0x441   : > { %4193 = vmatmul.mubr.bf16.vlgmr.msra.gmra.mrb[40].mxu0 %v2091_v13 }
 0x442   : > { %2277 = vmatmul.mubr.bf16.gmra.mrb[52].mxu1 %v2089_v9  ;;  %4197 = vmatpush3.bf16.msra.mxu0 %v4468_v14 }
 0x443   : > { %4198 = vmatprep.subr.bf16.mxu0 %v4985_v29  ;;  %3991 = vmatpush3.bf16.msra.mxu1 %v4475_v20 }
 0x444   : > { %3992 = vmatprep.subr.bf16.mxu1 %v4476_v22  ;;  %4212 = vmatprep.mubr.msk.bf16.mxu0 %vm4648_vm0, %v4985_v29 }
 0x446   : > { %4199 = vmatpush3.bf16.msra.mxu0 %v4471_v17 }
 0x447   : > { %4200 = vmatprep.subr.bf16.mxu0 %v4985_v29  ;;  %3993 = vmatpush3.bf16.msra.mxu1 %v4478_v24 }
 0x448   : > { %3994 = vmatprep.subr.bf16.mxu1 %v4479_v26 }
 0x44a   : > { %4201 = vmatpush3.bf16.msra.mxu0 %v4474_v19 }
 0x44b   : > { %4202 = vmatprep.subr.bf16.mxu0 %v4985_v29  ;;  %3995 = vmatpush3.bf16.msra.mxu1 %v4481_v28 }
 0x44c   : > { %3996 = vmatprep.subr.bf16.mxu1 %v4482_v30  ;;  %v4492_v30 = vld [vmem:[#allocation4 + $0x440] sm:$0xff]  }
 0x44e   : > { %4203 = vmatpush3.bf16.msra.mxu0 %v4477_v23 }
 0x44f   : > { %4204 = vmatprep.subr.bf16.mxu0 %v4985_v29  ;;  %3997 = vmatpush3.bf16.msra.mxu1 %v4484_v32 }
 0x450   : > { %3998 = vmatprep.subr.bf16.mxu1 %v4485_v33 }
 0x452   : > { %4205 = vmatpush3.bf16.msra.mxu0 %v4480_v27 }
 0x453   : > { %4206 = vmatprep.subr.bf16.mxu0 %v4985_v29  ;;  %3999 = vmatpush3.bf16.msra.mxu1 %v4487_v35  ;;  %v4495_v35 = vld [vmem:[#allocation4 + $0x448] sm:$0xff]  }
 0x454   : > { %4000 = vmatprep.subr.bf16.mxu1 %v4488_v36  ;;  %v4496_v36 = vld [vmem:[#allocation4 + $0x3c8] sm:$0xff]  }
 0x456   : > { %4207 = vmatpush3.bf16.msra.mxu0 %v4483_v31  ;;  %v4493_v31 = vld [vmem:[#allocation4 + $0x3c0] sm:$0xff]  }
 0x457   : > { %4208 = vmatprep.subr.bf16.mxu0 %v4985_v29  ;;  %4001 = vmatpush3.bf16.msra.mxu1 %v4490_v38  ;;  %v4498_v38 = vld [vmem:[#allocation4 + $0x450] sm:$0xff]  }
 0x458   : > { %4017 = vmatprep.subr.bf16.mxu1 %v4491_v39  ;;  %v4499_v39 = vld [vmem:[#allocation4 + $0x3d0] sm:$0xff]  }
 0x45a   : > { %4209 = vmatpush3.bf16.msra.mxu0 %v4486_v34  ;;  %v4494_v34 = vld [vmem:[#allocation4 + $0x408] sm:$0xff]  }
 0x45b   : > { %4210 = vmatprep.subr.bf16.mxu0 %v4985_v29 }
 0x45e   : > { %4211 = vmatpush3.bf16.msra.mxu0 %v4489_v37  ;;  %v4497_v37 = vld [vmem:[#allocation4 + $0x410] sm:$0xff]  }
 0x45f   : > { %4216 = vmatprep.subr.bf16.mxu0 %v4985_v29 }
 0x50d   : > { %v3964_v21 = vpop.f32.mrb[48].mxu1 }
 0x50e   : > { %v3965_v40 = vpop.f32.mrb[49].mxu1 }
 0x50f   : > { %v3966_v41 = vadd.f32 %v3965_v40, %v3964_v21  ;;  %v3967_v42 = vpop.f32.mrb[50].mxu1  ;;  %v4500_v21 = vld [vmem:[#allocation4 + $0x418] sm:$0xff]  }
 0x510   : > { %v3968_v43 = vpop.f32.mrb[51].mxu1  ;;  %v4501_v40 = vld [vmem:[#allocation4 + $0x458] sm:$0xff]  }
 0x511   : > { %v3969_v25 = vadd.f32 %v3968_v43, %v3967_v42  ;;  %v4503_v42 = vld [vmem:[#allocation4 + $0x420] sm:$0xff]  }
 0x512   : > { %v4504_v43 = vld [vmem:[#allocation4 + $0x460] sm:$0xff]  }
 0x514   : > { %v4194_v44 = vpop.f32.mrb[40].mxu0 }
 0x515   : > { %v3970_v45 = vpop.f32.mrb[52].mxu1  ;;  %v2319_v46 = vpop.f32.mrb[41].mxu0 }
 0x516   : > { %v3971_v48 = vpop.f32.mrb[53].mxu1  ;;  %v2320_v49 = vadd.f32 %v3966_v41, %v2319_v46  ;;  %v4195_v51 = vpop.f32.mrb[42].mxu0  ;;  %v4502_v41 = vld [vmem:[#allocation4 + $0x3d8] sm:$0xff]   ;;  %v4508_v46 = vld [vmem:[#allocation4 + $0x3e8] sm:$0xff]  }
 0x517   : > { %v3972_v50 = vadd.f32 %v3971_v48, %v3970_v45  ;;  %v3973_v52 = vpop.f32.mrb[54].mxu1  ;;  %v2322_v55 = vpop.f32.mrb[43].mxu0  ;;  %v4507_v45 = vld [vmem:[#allocation4 + $0x468] sm:$0xff]   ;;  %v4510_v48 = vld [vmem:[#allocation4 + $0x470] sm:$0xff]  }
 0x518   : > { %v3974_v56 = vpop.f32.mrb[55].mxu1  ;;  %v2339_v57 = vmul.f32 %v3637_v47, %v2320_v49  ;;  %v2323_v59 = vadd.f32 %v3969_v25, %v2322_v55  ;;  %v4505_v25 = vld [vmem:[#allocation4 + $0x3e0] sm:$0xff]   ;;  %v4511_v49 = vld [vmem:[#allocation4 + $0x3f0] sm:$0xff]  }
 0x519   : > { %v2328_v58 = vadd.f32 %v4194_v44, %v3972_v50  ;;  %v3975_v60 = vadd.f32 %v3974_v56, %v3973_v52  ;;  %v4506_v44 = vld [vmem:[#allocation4 + $0x428] sm:$0xff]   ;;  %v4512_v50 = vld [vmem:[#allocation4 + $0x438] sm:$0xff]  }
 0x51a   : > { %v2348_v61 = vadd.f32 %v3638_v54, %v2339_v57  ;;  %v2340_v63 = vmul.f32 %v3637_v47, %v2323_v59  ;;  %v4514_v52 = vld [vmem:[#allocation4 + $0x3f8] sm:$0xff]  }
 0x51b   : > { %v2341_v62 = vmul.f32 %v3637_v47, %v2328_v58  ;;  %v2331_v0 = vadd.f32 %v4195_v51, %v3975_v60  ;;  %v4513_v51 = vld [vmem:[#allocation4 + $0x478] sm:$0xff]  }
 0x51c   : > { %v2352_v1 = vmax.f32 %v2348_v61, 0.0  ;;  %v2349_v3 = vadd.f32 %v3638_v54, %v2340_v63 }
 0x51d   : > { %v2350_v2 = vadd.f32 %v3638_v54, %v2341_v62  ;;  %v2342_v4 = vmul.f32 %v3637_v47, %v2331_v0  ;;  %v4509_v47 = vld [vmem:[#allocation4 + $0x430] sm:$0xff]   ;;  %v3663_v62 = vld [vmem:[%s5136_s3 + $0x5] ss:$0 sm:$0xff] }
 0x51e   : > { %2356 = vst [vmem:[#allocation2 + $0x8] sm:$0xff] %v2352_v1  ;;  %v2353_v6 = vmax.f32 %v2349_v3, 0.0  ;;  %v3664_v3 = vld [vmem:[%s5137_s4 + $0x5] ss:$0 sm:$0xff] }
 0x51f   : > { %v2354_v5 = vmax.f32 %v2350_v2, 0.0  ;;  %v2351_v7 = vadd.f32 %v3638_v54, %v2342_v4  ;;  %v4515_v54 = vld [vmem:[#allocation4 + $0x4c0] sm:$0xff]  }
 0x520   : > { %2357 = vst [vmem:[#allocation2 + $0x10] sm:$0xff] %v2353_v6 }
 0x521   : > { %2358 = vst [vmem:[#allocation2 + $0x18] sm:$0xff] %v2354_v5  ;;  %v2355_v8 = vmax.f32 %v2351_v7, 0.0 }
 0x523   : > { %2359 = vst [vmem:[#allocation2 + $0x20] sm:$0xff] %v2355_v8 }
 0x527   : > { %v2421_v11 = vld [vmem:[#allocation2 + $0x8] ss:$2 sm:$0xff]  ;;  %v2425_v12 = vld [vmem:[#allocation2 + $0x9] ss:$2 sm:$0xff] }
 0x528   : > { %v2431_v13 = vld [vmem:[#allocation2 + $0xa] ss:$2 sm:$0xff]  ;;  %v2435_v9 = vld [vmem:[#allocation2 + $0xb] ss:$2 sm:$0xff]  ;;  %v2428_v10 = vmax.f32 %v2421_v11, %v2425_v12 }
 0x529   : > { %v2411_v53 = vld [vmem:[#allocation2 + $0x6] ss:$2 sm:$0xff]  ;;  %v2415_v14 = vld [vmem:[#allocation2 + $0x7] ss:$2 sm:$0xff]  ;;  %v2438_v23 = vmax.f32 %v2431_v13, %v2435_v9 }
 0x52a   : > { %v2423_v15 = vld [vmem:[#allocation2 + $0x18] ss:$2 sm:$0xff]  ;;  %v2427_v16 = vld [vmem:[#allocation2 + $0x19] ss:$2 sm:$0xff]  ;;  %v2418_v26 = vmax.f32 %v2411_v53, %v2415_v14 }
 0x52b   : > { %v2433_v17 = vld [vmem:[#allocation2 + $0x1a] ss:$2 sm:$0xff]  ;;  %v2429_v18 = vmax.f32 %v2423_v15, %v2427_v16  ;;  %v2437_v19 = vld [vmem:[#allocation2 + $0x1b] ss:$2 sm:$0xff] }
 0x52c   : > { %v2413_v20 = vld [vmem:[#allocation2 + $0x16] ss:$2 sm:$0xff]  ;;  %v2417_v22 = vld [vmem:[#allocation2 + $0x17] ss:$2 sm:$0xff]  ;;  %v2439_v24 = vmax.f32 %v2433_v17, %v2437_v19  ;;  %v4518_v19 = vld [vmem:[#allocation4 + $0x4c8] sm:$0xff]  }
 0x52d   : > { %v2419_v27 = vmax.f32 %v2413_v20, %v2417_v22  ;;  %2990 = vst [vmem:[#allocation2 + $0x18] sm:$0xff] %v4985_v29  ;;  %v2441_v28 = vpack.c.bf16 %v2429_v18, %v2428_v10  ;;  %v4516_v53 = vld [vmem:[#allocation4 + $0x500] sm:$0xff]   ;;  %v4519_v20 = vld [vmem:[#allocation4 + $0x508] sm:$0xff]  }
 0x52e   : > { %v2442_v32 = vpack.c.bf16 %v2439_v24, %v2438_v23  ;;  %v4517_v14 = vld [vmem:[#allocation4 + $0x480] sm:$0xff]   ;;  %v4520_v22 = vld [vmem:[#allocation4 + $0x488] sm:$0xff]   ;;  %v4521_v23 = vld [vmem:[#allocation4 + $0x4d0] sm:$0xff]  }
 0x52f   : > { %v2440_v33 = vpack.c.bf16 %v2419_v27, %v2418_v26  ;;  %2619 = vmatprep.mubr.bf16.mxu1 %v2441_v28  ;;  %v4522_v24 = vld [vmem:[#allocation4 + $0x510] sm:$0xff]   ;;  %v4524_v27 = vld [vmem:[#allocation4 + $0x4d8] sm:$0xff]  }
 0x530   : > { %4213 = vmatmul.mubr.bf16.vlgmr.msra.gmra.mrb[44].mxu0 %v2442_v32  ;;  %v4523_v26 = vld [vmem:[#allocation4 + $0x490] sm:$0xff]   ;;  %v4525_v28 = vld [vmem:[#allocation4 + $0x518] sm:$0xff]   ;;  %v4528_v32 = vld [vmem:[#allocation4 + $0x520] sm:$0xff]  }
 0x531   : > { %2620 = vmatmul.mubr.bf16.vlgmr.msra.gmra.mrb[56].mxu1 %v2440_v33  ;;  %4217 = vmatpush3.bf16.msra.mxu0 %v4492_v30  ;;  %v4526_v30 = vld [vmem:[#allocation4 + $0x498] sm:$0xff]   ;;  %v4529_v33 = vld [vmem:[#allocation4 + $0x4a0] sm:$0xff]  }
 0x532   : > { %4018 = vmatpush3.bf16.msra.mxu1 %v4493_v31  ;;  %4218 = vmatprep.subr.bf16.mxu0 %v4985_v29  ;;  %v4527_v31 = vld [vmem:[#allocation4 + $0x4e0] sm:$0xff]  }
 0x533   : > { %4019 = vmatprep.subr.bf16.mxu1 %v4494_v34  ;;  %4232 = vmatprep.mubr.msk.bf16.mxu0 %vm4648_vm0, %v4985_v29  ;;  %v4530_v34 = vld [vmem:[#allocation4 + $0x4e8] sm:$0xff]  }
 0x535   : > { %4219 = vmatpush3.bf16.msra.mxu0 %v4495_v35  ;;  %v4531_v35 = vld [vmem:[#allocation4 + $0x528] sm:$0xff]  }
 0x536   : > { %4020 = vmatpush3.bf16.msra.mxu1 %v4496_v36  ;;  %4220 = vmatprep.subr.bf16.mxu0 %v4985_v29  ;;  %v4532_v36 = vld [vmem:[#allocation4 + $0x4a8] sm:$0xff]  }
 0x537   : > { %4021 = vmatprep.subr.bf16.mxu1 %v4497_v37  ;;  %v4533_v37 = vld [vmem:[#allocation4 + $0x4f0] sm:$0xff]  }
 0x539   : > { %4221 = vmatpush3.bf16.msra.mxu0 %v4498_v38  ;;  %v4534_v38 = vld [vmem:[#allocation4 + $0x530] sm:$0xff]  }
 0x53a   : > { %4022 = vmatpush3.bf16.msra.mxu1 %v4499_v39  ;;  %4222 = vmatprep.subr.bf16.mxu0 %v4985_v29  ;;  %v4535_v39 = vld [vmem:[#allocation4 + $0x4b0] sm:$0xff]  }
 0x53b   : > { %4023 = vmatprep.subr.bf16.mxu1 %v4500_v21  ;;  %v4536_v21 = vld [vmem:[#allocation4 + $0x4f8] sm:$0xff]  }
 0x53d   : > { %4223 = vmatpush3.bf16.msra.mxu0 %v4501_v40  ;;  %v4537_v40 = vld [vmem:[#allocation4 + $0x538] sm:$0xff]  }
 0x53e   : > { %4024 = vmatpush3.bf16.msra.mxu1 %v4502_v41  ;;  %4224 = vmatprep.subr.bf16.mxu0 %v4985_v29  ;;  %v4538_v41 = vld [vmem:[#allocation4 + $0x4b8] sm:$0xff]  }
 0x53f   : > { %4025 = vmatprep.subr.bf16.mxu1 %v4503_v42 }
 0x541   : > { %4225 = vmatpush3.bf16.msra.mxu0 %v4504_v43 }
 0x542   : > { %4026 = vmatpush3.bf16.msra.mxu1 %v4505_v25  ;;  %4226 = vmatprep.subr.bf16.mxu0 %v4985_v29 }
 0x543   : > { %4027 = vmatprep.subr.bf16.mxu1 %v4506_v44 }
 0x545   : > { %4227 = vmatpush3.bf16.msra.mxu0 %v4507_v45 }
 0x546   : > { %4028 = vmatpush3.bf16.msra.mxu1 %v4508_v46  ;;  %4228 = vmatprep.subr.bf16.mxu0 %v4985_v29 }
 0x547   : > { %4029 = vmatprep.subr.bf16.mxu1 %v4509_v47 }
 0x549   : > { %4229 = vmatpush3.bf16.msra.mxu0 %v4510_v48  ;;  %v3689_v48 = vld [vmem:[%s5136_s3 + $0x6] ss:$0 sm:$0xff] }
 0x54a   : > { %4030 = vmatpush3.bf16.msra.mxu1 %v4511_v49  ;;  %4230 = vmatprep.subr.bf16.mxu0 %v4985_v29 }
 0x54b   : > { %4031 = vmatprep.subr.bf16.mxu1 %v4512_v50 }
 0x54d   : > { %4231 = vmatpush3.bf16.msra.mxu0 %v4513_v51 }
 0x54e   : > { %4032 = vmatpush3.bf16.msra.mxu1 %v4514_v52  ;;  %4236 = vmatprep.subr.bf16.mxu0 %v4985_v29 }
 0x54f   : > { %4048 = vmatprep.subr.bf16.mxu1 %v4515_v54  ;;  %v3690_v54 = vld [vmem:[%s5137_s4 + $0x6] ss:$0 sm:$0xff] }
 0x603   : > { %v2662_v55 = vpop.f32.mrb[44].mxu0 }
 0x604   : > { %v4002_v56 = vpop.f32.mrb[56].mxu1  ;;  %v4214_v57 = vpop.f32.mrb[45].mxu0 }
 0x605   : > { %v4003_v58 = vpop.f32.mrb[57].mxu1  ;;  %v2665_v60 = vpop.f32.mrb[46].mxu0 }
 0x606   : > { %v4004_v59 = vadd.f32 %v4003_v58, %v4002_v56  ;;  %v4005_v61 = vpop.f32.mrb[58].mxu1  ;;  %v4215_v63 = vpop.f32.mrb[47].mxu0 }
 0x607   : > { %v4006_v0 = vpop.f32.mrb[59].mxu1 }
 0x608   : > { %v2663_v1 = vadd.f32 %v4004_v59, %v2662_v55  ;;  %v4007_v2 = vadd.f32 %v4006_v0, %v4005_v61 }
 0x60a   : > { %v2674_v4 = vmul.f32 %v3663_v62, %v2663_v1  ;;  %v2666_v5 = vadd.f32 %v4007_v2, %v2665_v60 }
 0x60c   : > { %v2681_v6 = vadd.f32 %v3664_v3, %v2674_v4  ;;  %v2675_v7 = vmul.f32 %v3663_v62, %v2666_v5 }
 0x60e   : > { %v2683_v8 = vmax.f32 %v2681_v6, 0.0  ;;  %v2682_v11 = vadd.f32 %v3664_v3, %v2675_v7 }
 0x610   : > { %2685 = vst [vmem:[#allocation3 + $0x8] sm:$0xff] %v2683_v8  ;;  %v2684_v12 = vmax.f32 %v2682_v11, 0.0  ;;  %v4539_v11 = vld [vmem:[%s5138_s5] sm:$0xff]  }
 0x612   : > { %2686 = vst [vmem:[#allocation3 + $0x10] sm:$0xff] %v2684_v12  ;;  %v2744_v13 = vpack.c.bf16 %v2684_v12, %v2683_v8 }
 0x614   : > { %2922 = vmatprep.mubr.bf16.mxu1 %v2744_v13  ;;  %v4540_v13 = vld [vmem:[%s5138_s5 + $0x8] sm:$0xff]  }
 0x617   : > { %v2737_v9 = vld [vmem:[#allocation3 + $0x7] sm:$0xff] }
 0x619   : > { %v2741_v15 = vld [vmem:[#allocation3 + $0x9] sm:$0xff]  ;;  %v2742_v16 = vld [vmem:[#allocation3 + $0x11] sm:$0xff] }
 0x61a   : > { %v2738_v17 = vld [vmem:[#allocation3 + $0xf] sm:$0xff]  ;;  %v2745_v10 = vpack.c.bf16 %v2742_v16, %v2741_v15  ;;  %v4544_v15 = vld [vmem:[%s5138_s5 + $0x28] sm:$0xff]   ;;  %v4545_v16 = vld [vmem:[%s5138_s5 + $0x30] sm:$0xff]  }
 0x61b   : > { %v2743_v18 = vpack.c.bf16 %v2738_v17, %v2737_v9  ;;  %v4541_v9 = vld [vmem:[%s5138_s5 + $0x10] sm:$0xff]   ;;  %v4546_v17 = vld [vmem:[%s5138_s5 + $0x38] sm:$0xff]  }
 0x61c   : > { %4233 = vmatmul.mubr.bf16.vlgmr.msra.gmra.mrb[48].mxu0 %v2745_v10 }
 0x61d   : > { %2923 = vmatmul.mubr.bf16.vlgmr.msra.gmra.mrb[60].mxu1 %v2743_v18  ;;  %4237 = vmatpush3.bf16.msra.mxu0 %v4516_v53  ;;  %v4542_v53 = vld [vmem:[%s5138_s5 + $0x18] sm:$0xff]  }
 0x61e   : > { %4049 = vmatpush3.bf16.msra.mxu1 %v4517_v14  ;;  %4238 = vmatprep.subr.bf16.mxu0 %v4985_v29  ;;  %v4543_v14 = vld [vmem:[%s5138_s5 + $0x20] sm:$0xff]  }
 0x61f   : > { %4252 = vmatprep.mubr.msk.bf16.mxu0 %vm4648_vm0, %v4985_v29  ;;  %4050 = vmatprep.subr.bf16.mxu1 %v4518_v19 }
 0x621   : > { %4239 = vmatpush3.bf16.msra.mxu0 %v4519_v20 }
 0x622   : > { %4051 = vmatpush3.bf16.msra.mxu1 %v4520_v22  ;;  %4240 = vmatprep.subr.bf16.mxu0 %v4985_v29 }
 0x623   : > { %4052 = vmatprep.subr.bf16.mxu1 %v4521_v23 }
 0x625   : > { %4241 = vmatpush3.bf16.msra.mxu0 %v4522_v24 }
 0x626   : > { %4053 = vmatpush3.bf16.msra.mxu1 %v4523_v26  ;;  %4242 = vmatprep.subr.bf16.mxu0 %v4985_v29 }
 0x627   : > { %4054 = vmatprep.subr.bf16.mxu1 %v4524_v27  ;;  %v3715_v27 = vld [vmem:[%s5136_s3 + $0x7] ss:$0 sm:$0xff] }
 0x629   : > { %4243 = vmatpush3.bf16.msra.mxu0 %v4525_v28 }
 0x62a   : > { %4055 = vmatpush3.bf16.msra.mxu1 %v4526_v30  ;;  %4244 = vmatprep.subr.bf16.mxu0 %v4985_v29 }
 0x62b   : > { %4056 = vmatprep.subr.bf16.mxu1 %v4527_v31 }
 0x62d   : > { %4245 = vmatpush3.bf16.msra.mxu0 %v4528_v32 }
 0x62e   : > { %4057 = vmatpush3.bf16.msra.mxu1 %v4529_v33  ;;  %4246 = vmatprep.subr.bf16.mxu0 %v4985_v29 }
 0x62f   : > { %4058 = vmatprep.subr.bf16.mxu1 %v4530_v34 }
 0x631   : > { %4247 = vmatpush3.bf16.msra.mxu0 %v4531_v35 }
 0x632   : > { %4059 = vmatpush3.bf16.msra.mxu1 %v4532_v36  ;;  %4248 = vmatprep.subr.bf16.mxu0 %v4985_v29 }
 0x633   : > { %4060 = vmatprep.subr.bf16.mxu1 %v4533_v37 }
 0x635   : > { %4249 = vmatpush3.bf16.msra.mxu0 %v4534_v38 }
 0x636   : > { %4061 = vmatpush3.bf16.msra.mxu1 %v4535_v39  ;;  %4250 = vmatprep.subr.bf16.mxu0 %v4985_v29 }
 0x637   : > { %4062 = vmatprep.subr.bf16.mxu1 %v4536_v21 }
 0x639   : > { %4251 = vmatpush3.bf16.msra.mxu0 %v4537_v40 }
 0x63a   : > { %4063 = vmatpush3.bf16.msra.mxu1 %v4538_v41  ;;  %v3316_v41 = vld [vmem:[%s5139_s6] sm:$0x1] }
 0x63b   : > { %4256 = vmatprep.subr.bf16.mxu1 %v4985_v29 }
 0x6ef   : > { %v2965_v42 = vpop.f32.mrb[48].mxu0 }
 0x6f0   : > { %v4033_v43 = vpop.f32.mrb[60].mxu1  ;;  %v4234_v25 = vpop.f32.mrb[49].mxu0 }
 0x6f1   : > { %v4034_v44 = vpop.f32.mrb[61].mxu1  ;;  %v2968_v46 = vpop.f32.mrb[50].mxu0 }
 0x6f2   : > { %v4035_v45 = vadd.f32 %v4034_v44, %v4033_v43  ;;  %v4036_v47 = vpop.f32.mrb[62].mxu1  ;;  %v4235_v49 = vpop.f32.mrb[51].mxu0 }
 0x6f3   : > { %v4037_v50 = vpop.f32.mrb[63].mxu1 }
 0x6f4   : > { %v2966_v51 = vadd.f32 %v4035_v45, %v2965_v42  ;;  %v4038_v52 = vadd.f32 %v4037_v50, %v4036_v47 }
 0x6f6   : > { %v2977_v55 = vmul.f32 %v3689_v48, %v2966_v51  ;;  %v2969_v56 = vadd.f32 %v4038_v52, %v2968_v46 }
 0x6f8   : > { %v2984_v57 = vadd.f32 %v3690_v54, %v2977_v55  ;;  %v2978_v58 = vmul.f32 %v3689_v48, %v2969_v56 }
 0x6fa   : > { %v2986_v59 = vmax.f32 %v2984_v57, 0.0  ;;  %v2985_v60 = vadd.f32 %v3690_v54, %v2978_v58 }
 0x6fc   : > { %2988 = vst [vmem:[#allocation2 + $0x8] sm:$0xff] %v2986_v59  ;;  %v2987_v61 = vmax.f32 %v2985_v60, 0.0 }
 0x6fe   : > { %2989 = vst [vmem:[#allocation2 + $0x10] sm:$0xff] %v2987_v61 }
 0x705   : > { %v3043_v62 = vld [vmem:[#allocation2 + $0xa] ss:$2 sm:$0x3f]  ;;  %v3044_v63 = vld [vmem:[#allocation2 + $0xb] ss:$2 sm:$0x3f] }
 0x706   : > { %v3045_v0 = vmax.f32 %v3043_v62, %v3044_v63  ;;  %v3047_v1 = vld [vmem:[#allocation2 + $0xc] ss:$2 sm:$0x3f]  ;;  %v3049_v2 = vld [vmem:[#allocation2 + $0xd] ss:$2 sm:$0x3f] }
 0x707   : > { %v3050_v3 = vmax.f32 %v3047_v1, %v3049_v2  ;;  %v3040_v4 = vld [vmem:[#allocation2 + $0x8] ss:$2 sm:$0x3f]  ;;  %v3041_v5 = vld [vmem:[#allocation2 + $0x9] ss:$2 sm:$0x3f] }
 0x708   : > { %v3052_v6 = vpack.c.bf16 %v3045_v0, %v3045_v0  ;;  %v3042_v7 = vmax.f32 %v3040_v4, %v3041_v5 }
 0x709   : > { %v3053_v8 = vpack.c.bf16 %v3050_v3, %v3050_v3 }
 0x70a   : > { %3230 = vmatprep.mubr.bf16.mxu1 %v3052_v6  ;;  %v3051_v12 = vpack.c.bf16 %v3042_v7, %v3042_v7 }
 0x70b   : > { %4253 = vmatmul.mubr.bf16.vlgmr.msra.gmra.mrb[52].mxu0 %v3053_v8 }
 0x70c   : > { %3231 = vmatmul.mubr.bf16.vlgmr.msra.gmra.mrb[64].mxu1 %v3051_v12 }
 0x70d   : > { %4257 = vmatpush3.bf16.msra.mxu1 %v4539_v11  ;;  %4272 = vmatprep.mubr.msk.bf16.mxu1 %vm4648_vm0, %v4985_v29 }
 0x70e   : > { %4258 = vmatprep.subr.bf16.mxu1 %v4985_v29 }
 0x711   : > { %4259 = vmatpush3.bf16.msra.mxu1 %v4540_v13 }
 0x712   : > { %4260 = vmatprep.subr.bf16.mxu1 %v4985_v29 }
 0x715   : > { %4261 = vmatpush3.bf16.msra.mxu1 %v4541_v9 }
 0x716   : > { %4262 = vmatprep.subr.bf16.mxu1 %v4985_v29 }
 0x719   : > { %4263 = vmatpush3.bf16.msra.mxu1 %v4542_v53 }
 0x71a   : > { %4264 = vmatprep.subr.bf16.mxu1 %v4985_v29 }
 0x71d   : > { %4265 = vmatpush3.bf16.msra.mxu1 %v4543_v14 }
 0x71e   : > { %4266 = vmatprep.subr.bf16.mxu1 %v4985_v29 }
 0x721   : > { %4267 = vmatpush3.bf16.msra.mxu1 %v4544_v15 }
 0x722   : > { %4268 = vmatprep.subr.bf16.mxu1 %v4985_v29 }
 0x725   : > { %4269 = vmatpush3.bf16.msra.mxu1 %v4545_v16 }
 0x726   : > { %4270 = vmatprep.subr.bf16.mxu1 %v4985_v29  ;;  %v3716_v29 = vld [vmem:[%s5137_s4 + $0x7] ss:$0 sm:$0xff] }
 0x729   : > { %4271 = vmatpush3.bf16.msra.mxu1 %v4546_v17 }
 0x7de   : > { %v3272_v10 = vpop.f32.mrb[52].mxu0 }
 0x7df   : > { %v4064_v18 = vpop.f32.mrb[64].mxu1  ;;  %v4254_v19 = vpop.f32.mrb[53].mxu0 }
 0x7e0   : > { %v4065_v20 = vpop.f32.mrb[65].mxu1  ;;  %v3275_v22 = vpop.f32.mrb[54].mxu0 }
 0x7e1   : > { %v4066_v23 = vadd.f32 %v4065_v20, %v4064_v18  ;;  %v4067_v24 = vpop.f32.mrb[66].mxu1  ;;  %v4255_v26 = vpop.f32.mrb[55].mxu0 }
 0x7e2   : > { %v4068_v28 = vpop.f32.mrb[67].mxu1 }
 0x7e3   : > { %v3273_v30 = vadd.f32 %v4066_v23, %v3272_v10 }
 0x7e5   : > { %v3283_v31 = vmul.f32 %v3715_v27, %v3273_v30 }
 0x7e7   : > { %v3289_v32 = vadd.f32 %v3716_v29, %v3283_v31 }
 0x7e9   : > { %v3290_v33 = vmax.f32 %v3289_v32, 0.0 }
 0x7eb   : > { %v3292_v34 = vsel %vm3291_vm1, %v3290_v33, -inf }
 0x7ec   : > { %v3293_v35 = vrot.slane %v3292_v34, 4 }
 0x7ee   : > { %v3294_v36 = vmax.f32 %v3292_v34, %v3293_v35 }
 0x7f0   : > { %v3295_v37 = vrot.slane %v3294_v36, 2 }
 0x7f2   : > { %v3296_v38 = vmax.f32 %v3294_v36, %v3295_v37 }
 0x7f4   : > { %v3297_v39 = vrot.slane %v3296_v38, 1 }
 0x7f6   : > { %v3298_v21 = vmax.f32 %v3296_v38, %v3297_v39 }
 0x7f8   : > { %v3299_v40 = vpack.c.bf16 %v3298_v21, %v3298_v21 }
 0x7fa   : > { %4273 = vmatmul.mubr.bf16.vlgmr.msra.gmra.mrb[68].mxu1 %v3299_v40 }
 0x8cd   : > { %v3399_v42 = vpop.f32.mrb[68].mxu1 }
 0x8ce   : > { %v3400_v43 = vadd.f32 %v3399_v42, %v3316_v41  ;;  %v4274_v25 = vpop.f32.mrb[69].mxu1 }
 0x8cf   : > { %v3402_v44 = vpop.f32.mrb[70].mxu1 }
 0x8d0   : > { %3405 = vst [vmem:[%s285_s17] sm:$0x1] %v3400_v43  ;;  %v4275_v45 = vpop.f32.mrb[71].mxu1 }
 0x8d1   : > { %4589 = shalt.err (!%p4586_p7)
}
 0x8d2   : > { %s4590_s20 = scalar_lea.hbm %s5091_s23, 16  ;;  %s4594_s8 = scalar_lea.hbm %s5140_s7, 32 }
 0x8d3   : > { %p4591_p8 = scmp.ne.s32.totalorder %s5091_s23, %s4590_s20  ;;  %p4595_p1 = scmp.lt.u32.totalorder %s5091_s23, %s5140_s7 }
 0x8d4   : > { %p4596_p0 = scmp.lt.u32.totalorder %s4594_s8, %s4590_s20  ;;  %p4598_p6 = scmp.lt.u32.totalorder %s4590_s20, %s5091_s23 }
 0x8d5   : > { %p4592_p11 = pnand %p4591_p8, %p5151_p9 }
 0x8d6   : > { %p4597_p5 = por %p4596_p0, %p4595_p1 }
 0x8d7   : > { %p4593_p13 = pneg %p4592_p11 }
 0x8d8   : > { %p4599_p10 = por %p4598_p6, %p4597_p5 }
 0x8da   : > { %p4600_p12 = pnand %p4599_p10, %p4593_p13 }
 0x8dc   : > { %4603 = shalt.err (!%p4600_p12)
}
 0x8dd   : > { %4281 = dma.vmem_to_hbm [thread:$0]  (%p5151_p9), %s5093_s9, 16, %s5091_s23, %s3407_s21  }
 0x8de PF: > { %p4293_p2 = scmp.ge.s32.totalorder %s4642_s27, 2  ;;  %s3431_s18 = sand.u32 1, %s4630_s24  }
 0x8df   : > { %p5152_p3 = scmp.ne.s32.totalorder %s5145_s12, 0  ;;  %s3432_s19 = scalar_lea.sflag [#allocation6], %s3431_s18 }
 0x8e1   : > { %p4288_p4 = pnand %p4293_p2, %p5152_p3 }
 0x8e3   : > { %4625 = dma.done.wait (!%p4288_p4), %s3432_s19, 16  }
 0x8e4   : > { %4627 = vsyncadd (!%p4288_p4), %s3432_s19, 4294967280  ;;  %p18_p7 = scmp.ge.s32.totalorder %s4715_s30, 4   ;;  %s5153_s24 = smov %s4634_s25 }
 0x8e5   : > { %s5154_s25 = smov %s4638_s26  ;;  %s5155_s26 = smov %s4726_s10 }
 0x8e6   : > { %s5156_s27 = smov %s4715_s30  ;;  %20 = sbr.rel (!%p18_p7) target bundleno = 4 (0x4), region = 132 }
 0x8ed   :  { %3436 = vsyncpa [#allocation5], 1 }
 0x8ee   :  { %3438 = vsyncpa [#allocation5 + $0x1], 1 }
 0x8ef   :  { %3439 = vsyncpa [#allocation6], 1 }
 0x8f0   :  { %3441 = vsyncpa [#allocation6 + $0x1], 1 }

</bundles_post_ra>
